<compile_context>
chip_gen: v6e
topology: v6e:2x2x1
jax: 0.10.0
libtpu: 0.0.40
codegen_flags: <defaults>
</compile_context>

<pallas_src>
import numpy as np
import jax
import jax.numpy as jnp
from jax.experimental import pallas as pl
from jax.experimental.pallas import tpu as pltpu

# ----------------------------------------------------------------------------
# Architecture constants (the configuration the PyTorch module is built with).
# ----------------------------------------------------------------------------
_S0, _C0 = 16, 4                 # input spatial / channels
_K, _STRIDE, _PAD = 3, 2, 1      # both conv layers
_C1, _C2 = 8, 16                 # conv1 / conv2 output channels
_S1 = (_S0 + 2 * _PAD - _K) // _STRIDE + 1        # 8
_S2 = (_S1 + 2 * _PAD - _K) // _STRIDE + 1        # 4
_P1 = _S1 * _S1                  # 64 conv1 output positions
_P2 = _S2 * _S2                  # 16 conv2 output positions
_OUT = 10                        # FC head output units
_K1 = _P1 * _K * _K * _C0        # 2304: per-sample conv1 im2col width
_D1 = _P1 * _C1                  # 512:  conv1 activation width (pos-major)
_D2 = _P2 * _C2                  # 256:  conv2 activation width (pos-major)


# ----------------------------------------------------------------------------
# Fused kernel: one batch tile per grid step, three MXU matmuls, no scratch.
# ----------------------------------------------------------------------------
def _convnet_kernel(p1_ref, w1_ref, b1_ref, w2_ref, b2_ref, wfc_ref, bfc_ref,
                    o_ref):
    f32 = jnp.float32
    # conv1 (+bias+ReLU): block-diagonal im2col weight -> (BT, 512)
    h1 = jnp.dot(p1_ref[...], w1_ref[...], preferred_element_type=f32)
    h1 = jnp.maximum(h1 + b1_ref[...], 0.0)
    # conv2 (+bias+ReLU): gather/padding folded into w2e -> (BT, 256)
    h2 = jnp.dot(h1.astype(jnp.bfloat16), w2_ref[...], preferred_element_type=f32)
    h2 = jnp.maximum(h2 + b2_ref[...], 0.0)
    # FC head (NCHW flatten permutation folded into wfc) -> (BT, 10)
    out = jnp.dot(h2.astype(jnp.bfloat16), wfc_ref[...], preferred_element_type=f32)
    o_ref[...] = out + bfc_ref[...]


# ----------------------------------------------------------------------------
# Init-time parameter packing (all conv geometry folded into dense weights).
# Conv weights in PyTorch (C_out, C_in, kh, kw) layout, fc (OUT, FEAT).
# ----------------------------------------------------------------------------
def pack_params(conv1_w, conv1_b, conv2_w, conv2_b, fc_w, fc_b):
    w1 = np.asarray(conv1_w, np.float32)        # (C1, C0, K, K)
    w2 = np.asarray(conv2_w, np.float32)        # (C2, C1, K, K)
    fcw = np.asarray(fc_w, np.float32)          # (OUT, FEAT)

    # conv1: per-position im2col weight (36, 8), replicated block-diagonally so
    # (BT, 2304) @ (2304, 512) computes every output position at once with
    # columns ordered (pos, c1).
    w1_mat = w1.transpose(2, 3, 1, 0).reshape(_K * _K * _C0, _C1)     # (36, 8)
    w1e = np.kron(np.eye(_P1, dtype=np.float32), w1_mat)              # (2304, 512)
    b1e = np.tile(np.asarray(conv1_b, np.float32), _P1).reshape(1, _D1)

    # conv2: fold the strided/padded tap gather into the weight. Row index
    # = conv1 pos*8 + c1, col index = conv2 pos*16 + c2.  Out-of-bounds taps
    # (conv zero padding) simply have no entry.
    w2e = np.zeros((_D1, _D2), np.float32)
    for ho in range(_S2):
        for wo in range(_S2):
            for ky in range(_K):
                for kx in range(_K):
                    hi = _STRIDE * ho + ky - _PAD
                    wi = _STRIDE * wo + kx - _PAD
                    if 0 <= hi < _S1 and 0 <= wi < _S1:
                        p1 = hi * _S1 + wi
                        p2 = ho * _S2 + wo
                        w2e[p1 * _C1:(p1 + 1) * _C1,
                            p2 * _C2:(p2 + 1) * _C2] = w2[:, :, ky, kx].T
    b2e = np.tile(np.asarray(conv2_b, np.float32), _P2).reshape(1, _D2)

    # FC: fold PyTorch's NCHW flatten (feature = c2*16 + pos2) into the weight
    # so it can consume our (pos2, c2)-ordered activation directly.
    wfcp = fcw.reshape(_OUT, _C2, _P2).transpose(2, 1, 0).reshape(_D2, _OUT)
    bfcp = np.asarray(fc_b, np.float32).reshape(1, _OUT)

    return (jnp.asarray(w1e, jnp.bfloat16), jnp.asarray(b1e, jnp.float32),
            jnp.asarray(w2e, jnp.bfloat16), jnp.asarray(b2e, jnp.float32),
            jnp.asarray(wfcp, jnp.bfloat16), jnp.asarray(bfcp, jnp.float32))


# ----------------------------------------------------------------------------
# Per-forward host glue: im2col of the *input only* (must be read from HBM
# anyway), laid out (B, pos*36 + tap*4 + c_in) and cast to bf16.
# ----------------------------------------------------------------------------
def _build_patches1(x):
    B = x.shape[0]
    xp = jnp.pad(x, ((0, 0), (_PAD, _PAD), (_PAD, _PAD), (0, 0)))
    taps = []
    for ky in range(_K):
        for kx in range(_K):
            sl = xp[:, ky:ky + _STRIDE * (_S1 - 1) + 1:_STRIDE,
                       kx:kx + _STRIDE * (_S1 - 1) + 1:_STRIDE, :]  # (B,8,8,4)
            taps.append(sl)
    pat = jnp.stack(taps, axis=3)                # (B, 8, 8, 9, 4)
    return pat.reshape(B, _K1).astype(jnp.bfloat16)


def _choose_batch_tile(B):
    if B <= 16:
        return ((B + 7) // 8) * 8                # tiny batch: one aligned step
    bt = min(256, (B + 1) // 2)                  # >=2 steps so both v7x TCs work
    return max(8, (bt // 8) * 8)


def convnetwork_forward(x, packed, block_batch=None):
    """x: (B, S0, S0, C0) f32 -> (B, OUT) f32."""
    assert x.shape[1:] == (_S0, _S0, _C0)
    w1e, b1e, w2e, b2e, wfcp, bfcp = packed
    B = x.shape[0]
    bt = block_batch or _choose_batch_tile(B)

    p1 = _build_patches1(x)                      # (B, 2304) bf16
    n_steps = pl.cdiv(B, bt)
    Bp = n_steps * bt
    if Bp != B:
        p1 = jnp.pad(p1, ((0, Bp - B), (0, 0)))

    flops = 2 * Bp * (_K1 * _D1 + _D1 * _D2 + _D2 * _OUT)
    bytes_accessed = (Bp * _K1 * 2 + w1e.size * 2 + w2e.size * 2 + wfcp.size * 2
                      + (b1e.size + b2e.size + bfcp.size) * 4 + Bp * _OUT * 4)

    out = pl.pallas_call(
        _convnet_kernel,
        out_shape=jax.ShapeDtypeStruct((Bp, _OUT), jnp.float32),
        grid=(n_steps,),
        in_specs=[
            pl.BlockSpec((bt, _K1), lambda i: (i, 0)),     # batch tile of patches
            pl.BlockSpec((_K1, _D1), lambda i: (0, 0)),    # resident weights
            pl.BlockSpec((1, _D1), lambda i: (0, 0)),
            pl.BlockSpec((_D1, _D2), lambda i: (0, 0)),
            pl.BlockSpec((1, _D2), lambda i: (0, 0)),
            pl.BlockSpec((_D2, _OUT), lambda i: (0, 0)),
            pl.BlockSpec((1, _OUT), lambda i: (0, 0)),
        ],
        out_specs=pl.BlockSpec((bt, _OUT), lambda i: (i, 0)),
        compiler_params=pltpu.CompilerParams(
            dimension_semantics=("parallel",),
            vmem_limit_bytes=32 * 1024 * 1024),
        cost_estimate=pl.CostEstimate(flops=flops, transcendentals=0,
                                      bytes_accessed=bytes_accessed),
    )(p1, w1e, b1e, w2e, b2e, wfcp, bfcp)
    return out[:B]


# ----------------------------------------------------------------------------
# Pure-JAX references (for the in-script correctness check only).
# ----------------------------------------------------------------------------
def _reference_forward(x, params, use_bf16):
    w1, b1, w2, b2, wfc, bfc = params
    md = jnp.bfloat16 if use_bf16 else jnp.float32
    h = x
    for w, b in ((w1, b1), (w2, b2)):
        h = jax.lax.conv_general_dilated(
            h.astype(md), w.astype(md), (_STRIDE, _STRIDE),
            [(_PAD, _PAD), (_PAD, _PAD)],
            dimension_numbers=("NHWC", "OIHW", "NHWC"),
            preferred_element_type=jnp.float32)
        h = jax.nn.relu(h + b)
    feat = jnp.transpose(h, (0, 3, 1, 2)).reshape(x.shape[0], -1)
    return jnp.dot(feat.astype(md), wfc.astype(md).T,
                   preferred_element_type=jnp.float32) + bfc


if __name__ == "__main__":
    batch = 2
    key = jax.random.PRNGKey(0)
    k1, k2, k3, k4, k5, k6 = jax.random.split(key, 6)

    # Parameters in PyTorch layouts: Conv2d (C_out, C_in, kh, kw), Linear (OUT, FEAT).
    feat_dim = _P2 * _C2
    w1 = jax.random.normal(k1, (_C1, _C0, _K, _K), jnp.float32) / jnp.sqrt(_C0 * _K * _K)
    b1 = 0.01 * jax.random.normal(k2, (_C1,), jnp.float32)
    w2 = jax.random.normal(k3, (_C2, _C1, _K, _K), jnp.float32) / jnp.sqrt(_C1 * _K * _K)
    b2 = 0.01 * jax.random.normal(k4, (_C2,), jnp.float32)
    bound = jnp.sqrt(6.0 / (feat_dim + _OUT))                   # xavier_uniform
    wfc = jax.random.uniform(k5, (_OUT, feat_dim), jnp.float32, -bound, bound)
    bfc = jnp.zeros((_OUT,), jnp.float32)                       # constant_(0)

    packed = pack_params(w1, b1, w2, b2, wfc, bfc)              # init-time, once

    # Input equivalent to what shape_image reshapes to: (B, S, S, C_in).
    x = jax.random.normal(k6, (batch, _S0, _S0, _C0), jnp.float32)

    fwd = jax.jit(convnetwork_forward)
    out = jax.block_until_ready(fwd(x, packed))
    assert out.shape == (batch, _OUT)

    params = (w1, b1, w2, b2, wfc, bfc)
    # tight check vs. a reference with identical bf16-matmul / f32-accum semantics
    ref_bf = jax.block_until_ready(_reference_forward(x, params, use_bf16=True))
    assert jnp.allclose(out, ref_bf, rtol=1e-2, atol=1e-2), \
        float(jnp.max(jnp.abs(out - ref_bf)))
    # loose sanity check vs. the full-f32 PyTorch-semantics reference
    ref_f32 = jax.block_until_ready(_reference_forward(x, params, use_bf16=False))
    assert jnp.allclose(out, ref_f32, rtol=0.2, atol=0.2)

    print("KERNEL_OK")
</pallas_src>

<mosaic_0001>
module attributes {stable_mosaic.version = 11 : i64} {
  func.func @_convnet_kernel(%arg0: i32, %arg1: memref<8x2304xbf16, #tpu.memory_space<vmem>>, %arg2: memref<2304x512xbf16, #tpu.memory_space<vmem>>, %arg3: memref<1x512xf32, #tpu.memory_space<vmem>>, %arg4: memref<512x256xbf16, #tpu.memory_space<vmem>>, %arg5: memref<1x256xf32, #tpu.memory_space<vmem>>, %arg6: memref<256x10xbf16, #tpu.memory_space<vmem>>, %arg7: memref<1x10xf32, #tpu.memory_space<vmem>>, %arg8: memref<8x10xf32, #tpu.memory_space<vmem>>) attributes {dimension_semantics = [#tpu.dimension_semantics<parallel>], iteration_bounds = array<i64: 1>, scalar_prefetch = 0 : i64, scratch_operands = 0 : i64, tpu.core_type = #tpu.core_type<tc>, window_params = [{transform_indices = @transform_0, window_bounds = array<i64: 8, 2304>}, {pipeline_mode = #tpu.pipeline_mode<synchronous>, transform_indices = @transform_1, window_bounds = array<i64: 2304, 512>}, {pipeline_mode = #tpu.pipeline_mode<synchronous>, transform_indices = @transform_2, window_bounds = array<i64: 1, 512>}, {pipeline_mode = #tpu.pipeline_mode<synchronous>, transform_indices = @transform_3, window_bounds = array<i64: 512, 256>}, {pipeline_mode = #tpu.pipeline_mode<synchronous>, transform_indices = @transform_4, window_bounds = array<i64: 1, 256>}, {pipeline_mode = #tpu.pipeline_mode<synchronous>, transform_indices = @transform_5, window_bounds = array<i64: 256, 10>}, {pipeline_mode = #tpu.pipeline_mode<synchronous>, transform_indices = @transform_6, window_bounds = array<i64: 1, 10>}, {transform_indices = @transform_7, window_bounds = array<i64: 8, 10>}]} {
    %c0 = arith.constant 0 : index
    %c0_0 = arith.constant 0 : index
    %0 = vector.load %arg1[%c0, %c0_0] : memref<8x2304xbf16, #tpu.memory_space<vmem>>, vector<8x2304xbf16>
    %c0_1 = arith.constant 0 : index
    %c0_2 = arith.constant 0 : index
    %1 = vector.load %arg2[%c0_1, %c0_2] : memref<2304x512xbf16, #tpu.memory_space<vmem>>, vector<2304x512xbf16>
    %cst = arith.constant dense<0.000000e+00> : vector<8x512xf32>
    %2 = tpu.matmul %0, %1, %cst {dimension_numbers = #tpu.dot_dimension_numbers<[1], [0], [0], [1], [0, 0, 1, 1], [], []>} : vector<8x2304xbf16>, vector<2304x512xbf16>, vector<8x512xf32> -> vector<8x512xf32>
    %c0_3 = arith.constant 0 : index
    %c0_4 = arith.constant 0 : index
    %3 = vector.load %arg3[%c0_3, %c0_4] : memref<1x512xf32, #tpu.memory_space<vmem>>, vector<1x512xf32>
    %4 = vector.broadcast %3 : vector<1x512xf32> to vector<8x512xf32>
    %5 = arith.addf %2, %4 : vector<8x512xf32>
    %cst_5 = arith.constant 0.000000e+00 : f32
    %6 = vector.broadcast %cst_5 : f32 to vector<8x512xf32>
    %7 = arith.maximumf %5, %6 : vector<8x512xf32>
    %8 = arith.truncf %7 : vector<8x512xf32> to vector<8x512xbf16>
    %c0_6 = arith.constant 0 : index
    %c0_7 = arith.constant 0 : index
    %9 = vector.load %arg4[%c0_6, %c0_7] : memref<512x256xbf16, #tpu.memory_space<vmem>>, vector<512x256xbf16>
    %cst_8 = arith.constant dense<0.000000e+00> : vector<8x256xf32>
    %10 = tpu.matmul %8, %9, %cst_8 {dimension_numbers = #tpu.dot_dimension_numbers<[1], [0], [0], [1], [0, 0, 1, 1], [], []>} : vector<8x512xbf16>, vector<512x256xbf16>, vector<8x256xf32> -> vector<8x256xf32>
    %c0_9 = arith.constant 0 : index
    %c0_10 = arith.constant 0 : index
    %11 = vector.load %arg5[%c0_9, %c0_10] : memref<1x256xf32, #tpu.memory_space<vmem>>, vector<1x256xf32>
    %12 = vector.broadcast %11 : vector<1x256xf32> to vector<8x256xf32>
    %13 = arith.addf %10, %12 : vector<8x256xf32>
    %cst_11 = arith.constant 0.000000e+00 : f32
    %14 = vector.broadcast %cst_11 : f32 to vector<8x256xf32>
    %15 = arith.maximumf %13, %14 : vector<8x256xf32>
    %16 = arith.truncf %15 : vector<8x256xf32> to vector<8x256xbf16>
    %c0_12 = arith.constant 0 : index
    %c0_13 = arith.constant 0 : index
    %17 = vector.load %arg6[%c0_12, %c0_13] : memref<256x10xbf16, #tpu.memory_space<vmem>>, vector<256x10xbf16>
    %cst_14 = arith.constant dense<0.000000e+00> : vector<8x10xf32>
    %18 = tpu.matmul %16, %17, %cst_14 {dimension_numbers = #tpu.dot_dimension_numbers<[1], [0], [0], [1], [0, 0, 1, 1], [], []>} : vector<8x256xbf16>, vector<256x10xbf16>, vector<8x10xf32> -> vector<8x10xf32>
    %c0_15 = arith.constant 0 : index
    %c0_16 = arith.constant 0 : index
    %19 = vector.load %arg7[%c0_15, %c0_16] : memref<1x10xf32, #tpu.memory_space<vmem>>, vector<1x10xf32>
    %20 = vector.broadcast %19 : vector<1x10xf32> to vector<8x10xf32>
    %21 = arith.addf %18, %20 : vector<8x10xf32>
    %c0_17 = arith.constant 0 : index
    %c0_18 = arith.constant 0 : index
    %22 = vector.load %arg8[%c0_17, %c0_18] : memref<8x10xf32, #tpu.memory_space<vmem>>, vector<8x10xf32>
    tpu.vector_store %arg8[%c0_17, %c0_18], %21 {strides = array<i32>} : memref<8x10xf32, #tpu.memory_space<vmem>>, vector<8x10xf32>,
    return
  }
  func.func @transform_0(%arg0: i32) -> (i32, i32) {
    %c0_i32 = arith.constant 0 : i32
    %c0_i32_0 = arith.constant 0 : i32
    return %arg0, %c0_i32 : i32, i32
  }
  func.func @transform_1(%arg0: i32) -> (i32, i32) {
    %c0_i32 = arith.constant 0 : i32
    %c0_i32_0 = arith.constant 0 : i32
    %c0_i32_1 = arith.constant 0 : i32
    return %c0_i32, %c0_i32_0 : i32, i32
  }
  func.func @transform_2(%arg0: i32) -> (i32, i32) {
    %c0_i32 = arith.constant 0 : i32
    %c0_i32_0 = arith.constant 0 : i32
    %c0_i32_1 = arith.constant 0 : i32
    return %c0_i32, %c0_i32_0 : i32, i32
  }
  func.func @transform_3(%arg0: i32) -> (i32, i32) {
    %c0_i32 = arith.constant 0 : i32
    %c0_i32_0 = arith.constant 0 : i32
    %c0_i32_1 = arith.constant 0 : i32
    return %c0_i32, %c0_i32_0 : i32, i32
  }
  func.func @transform_4(%arg0: i32) -> (i32, i32) {
    %c0_i32 = arith.constant 0 : i32
    %c0_i32_0 = arith.constant 0 : i32
    %c0_i32_1 = arith.constant 0 : i32
    return %c0_i32, %c0_i32_0 : i32, i32
  }
  func.func @transform_5(%arg0: i32) -> (i32, i32) {
    %c0_i32 = arith.constant 0 : i32
    %c0_i32_0 = arith.constant 0 : i32
    %c0_i32_1 = arith.constant 0 : i32
    return %c0_i32, %c0_i32_0 : i32, i32
  }
  func.func @transform_6(%arg0: i32) -> (i32, i32) {
    %c0_i32 = arith.constant 0 : i32
    %c0_i32_0 = arith.constant 0 : i32
    %c0_i32_1 = arith.constant 0 : i32
    return %c0_i32, %c0_i32_0 : i32, i32
  }
  func.func @transform_7(%arg0: i32) -> (i32, i32) {
    %c0_i32 = arith.constant 0 : i32
    %c0_i32_0 = arith.constant 0 : i32
    return %arg0, %c0_i32 : i32, i32
  }
}

</mosaic_0001>

<bundles_post_ra>
// kernel: convnetwork_forward.1
= control target key start
LH: loop header
LB: loop body
LE: loop exit
PB: predicated region body
PF: predicated region fallthrough
CT: control target
= control target key end

     0   :  { %12 = vsyncpa [#allocation3], 0  ;;  %s7170_s0 = inlined_call_operand.vmem [shape: bf16[8,2304], index: 0, kind: input, shape index: {}]   ;;  %s7171_s1 = inlined_call_operand.hbm [shape: bf16[2304,512], index: 1, kind: input, shape index: {}]   ;;  %s7172_s2 = inlined_call_operand.hbm [shape: f32[1,512], index: 2, kind: input, shape index: {}]   ;;  %s7173_s3 = inlined_call_operand.hbm [shape: bf16[512,256], index: 3, kind: input, shape index: {}]   ;;  %s7174_s4 = inlined_call_operand.hbm [shape: f32[1,256], index: 4, kind: input, shape index: {}]   ;;  %s7175_s5 = inlined_call_operand.vmem [shape: bf16[256,10], index: 5, kind: input, shape index: {}]   ;;  %s7176_s6 = inlined_call_operand.hbm [shape: f32[1,10], index: 6, kind: input, shape index: {}]   ;;  %s7177_s7 = inlined_call_operand.vmem [shape: f32[8,10], index: 7, kind: output, shape index: {}]  }
   0x1   :  { %13 = vsyncpa [#allocation5], 0 }
   0x2   :  { %14 = vsyncpa [#allocation8], 0  ;;  %s6858_s24 = smov [#allocation4]   ;;  %s6859_s26 = smov [#allocation7]  }
   0x3   :  { %s35_s25 = sshll.u32 %s6858_s24, 4  ;;  %s57_s27 = sshll.u32 %s6859_s26, 4  ;;  %s36_s25 = int_to_ptr.vmem [resolvable:$true] %s35_s25  ;;  %s58_s27 = int_to_ptr.vmem [resolvable:$true] %s57_s27 }
   0x4   :  { %s6760_s28 = scalar_lea.vmem %s36_s25, 64  ;;  %p6765_p1 = scmp.lt.s32.totalorder %s36_s25, %s36_s25 }
   0x5   :  { %p6761_p0 = scmp.ne.s32.totalorder %s36_s25, %s6760_s28  ;;  %p6766_p2 = scmp.lt.s32.totalorder %s6760_s28, %s6760_s28 }
   0x7   :  { %p6767_p3 = por %p6766_p2, %p6765_p1 }
   0x9   :  { %p6768_p4 = pnand %p6767_p3, %p6761_p0 }
   0xb   :  { %6771 = shalt.err (!%p6768_p4)
}
   0xc   :  { %38 = dma.hbm_to_vmem [thread:$0]  %s7172_s2, 64, %s36_s25, [#allocation5]  }
   0xd   :  { %s6780_s8 = scalar_lea.vmem %s58_s27, 32  ;;  %p6785_p6 = scmp.lt.s32.totalorder %s58_s27, %s58_s27 }
   0xe   :  { %p6781_p5 = scmp.ne.s32.totalorder %s58_s27, %s6780_s8  ;;  %p6786_p7 = scmp.lt.s32.totalorder %s6780_s8, %s6780_s8 }
  0x10   :  { %p6787_p8 = por %p6786_p7, %p6785_p6 }
  0x12   :  { %p6788_p9 = pnand %p6787_p8, %p6781_p5 }
  0x14   :  { %6791 = shalt.err (!%p6788_p9)
}
  0x15   :  { %60 = dma.hbm_to_vmem [thread:$0]  %s7174_s4, 32, %s58_s27, [#allocation8]  }
  0x16   :  { %s6860_s11 = smov [#allocation2]  }
  0x17   :  { %s22_s12 = sshll.u32 %s6860_s11, 4  ;;  %s23_s12 = int_to_ptr.vmem [resolvable:$true] %s22_s12 }
  0x18   :  { %s6800_s13 = scalar_lea.vmem %s23_s12, 73728  ;;  %p6805_p11 = scmp.lt.s32.totalorder %s23_s12, %s23_s12 }
  0x19   :  { %p6801_p10 = scmp.ne.s32.totalorder %s23_s12, %s6800_s13  ;;  %p6806_p12 = scmp.lt.s32.totalorder %s6800_s13, %s6800_s13 }
  0x1b   :  { %p6807_p13 = por %p6806_p12, %p6805_p11 }
  0x1d   :  { %p6808_p0 = pnand %p6807_p13, %p6801_p10 }
  0x1f   :  { %6811 = shalt.err (!%p6808_p0)
}
  0x20   :  { %s6861_s2 = smov 256   ;;  %s6862_s14 = smov 16  }
  0x21   :  { %28 = dma.hbm_to_vmem [thread:$0]  %s7171_s1, 73728, %s23_s12, [#allocation3], %s6861_s2, %s6861_s2, %s6862_s14  }
  0x22   :  { %s6863_s17 = smov [#allocation6]  }
  0x23   :  { %s44_s18 = sshll.u32 %s6863_s17, 4  ;;  %s45_s18 = int_to_ptr.vmem [resolvable:$true] %s44_s18 }
  0x24   :  { %s6820_s4 = scalar_lea.vmem %s45_s18, 8192  ;;  %p6825_p2 = scmp.lt.s32.totalorder %s45_s18, %s45_s18 }
  0x25   :  { %p6821_p1 = scmp.ne.s32.totalorder %s45_s18, %s6820_s4  ;;  %p6826_p3 = scmp.lt.s32.totalorder %s6820_s4, %s6820_s4 }
  0x27   :  { %p6827_p4 = por %p6826_p3, %p6825_p2 }
  0x29   :  { %p6828_p5 = pnand %p6827_p4, %p6821_p1 }
  0x2b   :  { %6831 = shalt.err (!%p6828_p5)
}
  0x2c   :  { %s6864_s19 = smov 128   ;;  %s6865_s20 = smov 8  }
  0x2d   :  { %50 = dma.hbm_to_vmem [thread:$0]  %s7173_s3, 8192, %s45_s18, [#allocation5], %s6864_s19, %s6864_s19, %s6865_s20  }
  0x2e   :  { %s6866_s23 = smov [#allocation9]  }
  0x2f   :  { %s69_s24 = sshll.u32 %s6866_s23, 4  ;;  %s70_s24 = int_to_ptr.vmem [resolvable:$true] %s69_s24 }
  0x30   :  { %s6840_s1 = scalar_lea.vmem %s70_s24, 16  ;;  %s6844_s25 = scalar_lea.vmem %s70_s24, 32 }
  0x31   :  { %p6841_p6 = scmp.ne.s32.totalorder %s70_s24, %s6840_s1  ;;  %p6845_p7 = scmp.lt.s32.totalorder %s70_s24, %s70_s24 }
  0x32   :  { %p6846_p8 = scmp.lt.s32.totalorder %s6844_s25, %s6840_s1 }
  0x34   :  { %p6847_p9 = por %p6846_p8, %p6845_p7 }
  0x36   :  { %p6848_p10 = pnand %p6847_p9, %p6841_p6 }
  0x38   :  { %6851 = shalt.err (!%p6848_p10)
}
  0x39   :  { %72 = dma.hbm_to_vmem [thread:$0]  %s7176_s6, 16, %s70_s24, [#allocation8]  }
  0x3a   :  { %6852 = dma.done.wait [#allocation3], 73728  }
  0x3b   :  { %6853 = vsyncadd [#allocation3], 4294893568 }
  0x3c   :  { %6854 = dma.done.wait [#allocation5], 8256  }
  0x3d   :  { %6855 = vsyncadd [#allocation5], 4294959040 }
  0x3e   :  { %6856 = dma.done.wait [#allocation8], 48  }
  0x3f   :  { %6857 = vsyncadd [#allocation8], 4294967248  ;;  %v5757_v0 = vld [vmem:[#allocation2 + $0xe4] ss:$16 sps:$4 sm:$0xff]   ;;  %v5761_v2 = vld [vmem:[#allocation2 + $0xe0] ss:$16 sps:$4 sm:$0xff]  }
  0x40   :  { %v5759_v1 = vld [vmem:[#allocation2 + $0x2e4] ss:$16 sps:$4 sm:$0xff]   ;;  %3639 = vmatprep.subr.bf16.mxu0 %v5757_v0  ;;  %v5762_v3 = vld [vmem:[#allocation2 + $0x2e0] ss:$16 sps:$4 sm:$0xff]   ;;  %v90_v48 = vld [vmem:[%s7170_s0 + $0x8] sm:$0xff]  ;;  %vm5042_vm0 = vcmask 80896  }
  0x41   :  { %3680 = vmatprep.subr.bf16.mxu1 %v5759_v1  ;;  %v5763_v4 = vld [vmem:[#allocation2 + $0xc4] ss:$16 sps:$4 sm:$0xff]   ;;  %3640 = vmatpush1.bf16.msra.mxu0 %v5761_v2  ;;  %v5767_v6 = vld [vmem:[#allocation2 + $0xc0] ss:$16 sps:$4 sm:$0xff]   ;;  %v6930_v51 = vcombine.high %v90_v48, %v90_v48 }
  0x42   :  { %3681 = vmatpush1.bf16.msra.mxu1 %v5762_v3  ;;  %v5765_v5 = vld [vmem:[#allocation2 + $0x2c4] ss:$16 sps:$4 sm:$0xff]   ;;  %3641 = vmatprep.subr.bf16.mxu0 %v5763_v4  ;;  %v5768_v7 = vld [vmem:[#allocation2 + $0x2c0] ss:$16 sps:$4 sm:$0xff]  }
  0x43   :  { %3682 = vmatprep.subr.bf16.mxu1 %v5765_v5  ;;  %v5769_v8 = vld [vmem:[#allocation2 + $0xa4] ss:$16 sps:$4 sm:$0xff]   ;;  %v5773_v10 = vld [vmem:[#allocation2 + $0xa0] ss:$16 sps:$4 sm:$0xff]   ;;  %3712 = vmatprep.mubr.bf16.mxu1 %v6930_v51 }
  0x44   :  { %v5771_v9 = vld [vmem:[#allocation2 + $0x2a4] ss:$16 sps:$4 sm:$0xff]   ;;  %v5774_v11 = vld [vmem:[#allocation2 + $0x2a0] ss:$16 sps:$4 sm:$0xff]  }
  0x45   :  { %3642 = vmatpush1.bf16.msra.mxu0 %v5767_v6  ;;  %v5775_v12 = vld [vmem:[#allocation2 + $0x84] ss:$16 sps:$4 sm:$0xff]   ;;  %v5779_v14 = vld [vmem:[#allocation2 + $0x80] ss:$16 sps:$4 sm:$0xff]  }
  0x46   :  { %3683 = vmatpush1.bf16.msra.mxu1 %v5768_v7  ;;  %3643 = vmatprep.subr.bf16.mxu0 %v5769_v8  ;;  %v5777_v13 = vld [vmem:[#allocation2 + $0x284] ss:$16 sps:$4 sm:$0xff]   ;;  %v5780_v15 = vld [vmem:[#allocation2 + $0x280] ss:$16 sps:$4 sm:$0xff]   ;;  %v6936_v7 = vcombine.low %v90_v48, %v90_v48 }
  0x47   :  { %3684 = vmatprep.subr.bf16.mxu1 %v5771_v9  ;;  %v5781_v16 = vld [vmem:[#allocation2 + $0x64] ss:$16 sps:$4 sm:$0xff]   ;;  %v5785_v18 = vld [vmem:[#allocation2 + $0x60] ss:$16 sps:$4 sm:$0xff]  }
  0x48   :  { %v5783_v17 = vld [vmem:[#allocation2 + $0x264] ss:$16 sps:$4 sm:$0xff]   ;;  %v5786_v19 = vld [vmem:[#allocation2 + $0x260] ss:$16 sps:$4 sm:$0xff]  }
  0x49   :  { %3644 = vmatpush1.bf16.msra.mxu0 %v5773_v10  ;;  %v5787_v20 = vld [vmem:[#allocation2 + $0x44] ss:$16 sps:$4 sm:$0xff]   ;;  %v5791_v22 = vld [vmem:[#allocation2 + $0x40] ss:$16 sps:$4 sm:$0xff]  }
  0x4a   :  { %3685 = vmatpush1.bf16.msra.mxu1 %v5774_v11  ;;  %3645 = vmatprep.subr.bf16.mxu0 %v5775_v12  ;;  %v5789_v21 = vld [vmem:[#allocation2 + $0x244] ss:$16 sps:$4 sm:$0xff]   ;;  %v5792_v23 = vld [vmem:[#allocation2 + $0x240] ss:$16 sps:$4 sm:$0xff]  }
  0x4b   :  { %3686 = vmatprep.subr.bf16.mxu1 %v5777_v13  ;;  %v5793_v24 = vld [vmem:[#allocation2 + $0x24] ss:$16 sps:$4 sm:$0xff]   ;;  %v5797_v26 = vld [vmem:[#allocation2 + $0x20] ss:$16 sps:$4 sm:$0xff]  }
  0x4c   :  { %v5795_v25 = vld [vmem:[#allocation2 + $0x224] ss:$16 sps:$4 sm:$0xff]   ;;  %v5798_v27 = vld [vmem:[#allocation2 + $0x220] ss:$16 sps:$4 sm:$0xff]  }
  0x4d   :  { %3646 = vmatpush1.bf16.msra.mxu0 %v5779_v14  ;;  %v5799_v28 = vld [vmem:[#allocation2 + $0x4] ss:$16 sps:$4 sm:$0xff]   ;;  %v5803_v30 = vld [vmem:[#allocation2] ss:$16 sps:$4 sm:$0xff]  }
  0x4e   :  { %3687 = vmatpush1.bf16.msra.mxu1 %v5780_v15  ;;  %3647 = vmatprep.subr.bf16.mxu0 %v5781_v16  ;;  %v5801_v29 = vld [vmem:[#allocation2 + $0x204] ss:$16 sps:$4 sm:$0xff]   ;;  %v5804_v31 = vld [vmem:[#allocation2 + $0x200] ss:$16 sps:$4 sm:$0xff]  }
  0x4f   :  { %3688 = vmatprep.subr.bf16.mxu1 %v5783_v17  ;;  %v5805_v32 = vld [vmem:[#allocation2 + $0x1e4] ss:$16 sps:$4 sm:$0xff]   ;;  %v5809_v34 = vld [vmem:[#allocation2 + $0x1e0] ss:$16 sps:$4 sm:$0xff]  }
  0x50   :  { %v5807_v33 = vld [vmem:[#allocation2 + $0x3e4] ss:$16 sps:$4 sm:$0xff]   ;;  %v5810_v35 = vld [vmem:[#allocation2 + $0x3e0] ss:$16 sps:$4 sm:$0xff]  }
  0x51   :  { %3648 = vmatpush1.bf16.msra.mxu0 %v5785_v18  ;;  %v5811_v36 = vld [vmem:[#allocation2 + $0x1c4] ss:$16 sps:$4 sm:$0xff]   ;;  %v5815_v38 = vld [vmem:[#allocation2 + $0x1c0] ss:$16 sps:$4 sm:$0xff]  }
  0x52   :  { %3689 = vmatpush1.bf16.msra.mxu1 %v5786_v19  ;;  %3649 = vmatprep.subr.bf16.mxu0 %v5787_v20  ;;  %v5813_v37 = vld [vmem:[#allocation2 + $0x3c4] ss:$16 sps:$4 sm:$0xff]   ;;  %v5816_v39 = vld [vmem:[#allocation2 + $0x3c0] ss:$16 sps:$4 sm:$0xff]  }
  0x53   :  { %3690 = vmatprep.subr.bf16.mxu1 %v5789_v21  ;;  %v5817_v40 = vld [vmem:[#allocation2 + $0x1a4] ss:$16 sps:$4 sm:$0xff]   ;;  %v5821_v42 = vld [vmem:[#allocation2 + $0x1a0] ss:$16 sps:$4 sm:$0xff]  }
  0x54   :  { %v5819_v41 = vld [vmem:[#allocation2 + $0x3a4] ss:$16 sps:$4 sm:$0xff]   ;;  %v5822_v43 = vld [vmem:[#allocation2 + $0x3a0] ss:$16 sps:$4 sm:$0xff]  }
  0x55   :  { %3650 = vmatpush1.bf16.msra.mxu0 %v5791_v22  ;;  %v5823_v44 = vld [vmem:[#allocation2 + $0x184] ss:$16 sps:$4 sm:$0xff]   ;;  %v5827_v49 = vld [vmem:[#allocation2 + $0x180] ss:$16 sps:$4 sm:$0xff]  }
  0x56   :  { %3691 = vmatpush1.bf16.msra.mxu1 %v5792_v23  ;;  %3651 = vmatprep.subr.bf16.mxu0 %v5793_v24  ;;  %v5825_v45 = vld [vmem:[#allocation2 + $0x384] ss:$16 sps:$4 sm:$0xff]   ;;  %v5828_v50 = vld [vmem:[#allocation2 + $0x380] ss:$16 sps:$4 sm:$0xff]  }
  0x57   :  { %3692 = vmatprep.subr.bf16.mxu1 %v5795_v25  ;;  %v89_v46 = vld [vmem:[%s7170_s0] sm:$0xff] }
  0x58   :  { %v6925_v47 = vcombine.high %v89_v46, %v89_v46  ;;  %v5829_v52 = vld [vmem:[#allocation2 + $0x164] ss:$16 sps:$4 sm:$0xff]   ;;  %v5833_v54 = vld [vmem:[#allocation2 + $0x160] ss:$16 sps:$4 sm:$0xff]   ;;  %v6934_v6 = vcombine.low %v89_v46, %v89_v46 }
  0x59   :  { %3652 = vmatpush1.bf16.msra.mxu0 %v5797_v26  ;;  %v5831_v53 = vld [vmem:[#allocation2 + $0x364] ss:$16 sps:$4 sm:$0xff]   ;;  %v5834_v55 = vld [vmem:[#allocation2 + $0x360] ss:$16 sps:$4 sm:$0xff]  }
  0x5a   :  { %3693 = vmatpush1.bf16.msra.mxu1 %v5798_v27  ;;  %3653 = vmatprep.subr.bf16.mxu0 %v5799_v28  ;;  %v5835_v56 = vld [vmem:[#allocation2 + $0x144] ss:$16 sps:$4 sm:$0xff]   ;;  %v5839_v58 = vld [vmem:[#allocation2 + $0x140] ss:$16 sps:$4 sm:$0xff]  }
  0x5b   :  { %3694 = vmatprep.subr.bf16.mxu1 %v5801_v29  ;;  %3671 = vmatprep.mubr.bf16.mxu0 %v6925_v47  ;;  %v5837_v57 = vld [vmem:[#allocation2 + $0x344] ss:$16 sps:$4 sm:$0xff]   ;;  %v5840_v59 = vld [vmem:[#allocation2 + $0x340] ss:$16 sps:$4 sm:$0xff]  }
  0x5c   :  { %v5841_v60 = vld [vmem:[#allocation2 + $0x124] ss:$16 sps:$4 sm:$0xff]   ;;  %v5845_v62 = vld [vmem:[#allocation2 + $0x120] ss:$16 sps:$4 sm:$0xff]  }
  0x5d   :  { %3654 = vmatpush1.bf16.msra.mxu0 %v5803_v30  ;;  %v5843_v61 = vld [vmem:[#allocation2 + $0x324] ss:$16 sps:$4 sm:$0xff]   ;;  %v5846_v63 = vld [vmem:[#allocation2 + $0x320] ss:$16 sps:$4 sm:$0xff]  }
  0x5e   :  { %3695 = vmatpush1.bf16.msra.mxu1 %v5804_v31  ;;  %3655 = vmatprep.subr.bf16.mxu0 %v5805_v32  ;;  %v5847_v0 = vld [vmem:[#allocation2 + $0x104] ss:$16 sps:$4 sm:$0xff]   ;;  %v5851_v2 = vld [vmem:[#allocation2 + $0x100] ss:$16 sps:$4 sm:$0xff]  }
  0x5f   :  { %3696 = vmatprep.subr.bf16.mxu1 %v5807_v33  ;;  %v5849_v1 = vld [vmem:[#allocation2 + $0x304] ss:$16 sps:$4 sm:$0xff]   ;;  %v5852_v3 = vld [vmem:[#allocation2 + $0x300] ss:$16 sps:$4 sm:$0xff]   ;;  %v6948_v33 = vld [vmem:[%s7170_s0 + $0x18] sm:$0xff] }
  0x60   :  { %v5859_v4 = vld [vmem:[#allocation2 + $0x4e4] ss:$16 sps:$4 sm:$0xff]   ;;  %v5857_v8 = vld [vmem:[#allocation2 + $0x4e0] ss:$16 sps:$4 sm:$0xff]  }
  0x61   :  { %3656 = vmatpush2.bf16.msra.mxu0 %v5809_v34  ;;  %v5862_v5 = vld [vmem:[#allocation2 + $0x6e4] ss:$16 sps:$4 sm:$0xff]   ;;  %v5860_v9 = vld [vmem:[#allocation2 + $0x6e0] ss:$16 sps:$4 sm:$0xff]  }
  0x62   :  { %3697 = vmatpush2.bf16.msra.mxu1 %v5810_v35  ;;  %3657 = vmatprep.subr.bf16.mxu0 %v5811_v36  ;;  %v5865_v10 = vld [vmem:[#allocation2 + $0x4c4] ss:$16 sps:$4 sm:$0xff]   ;;  %v5863_v12 = vld [vmem:[#allocation2 + $0x4c0] ss:$16 sps:$4 sm:$0xff]  }
  0x63   :  { %3698 = vmatprep.subr.bf16.mxu1 %v5813_v37  ;;  %v5868_v11 = vld [vmem:[#allocation2 + $0x6c4] ss:$16 sps:$4 sm:$0xff]   ;;  %v5866_v13 = vld [vmem:[#allocation2 + $0x6c0] ss:$16 sps:$4 sm:$0xff]   ;;  %v6956_v37 = vcombine.high %v6948_v33, %v6948_v33 }
  0x64   :  { %v5871_v14 = vld [vmem:[#allocation2 + $0x4a4] ss:$16 sps:$4 sm:$0xff]   ;;  %v5869_v16 = vld [vmem:[#allocation2 + $0x4a0] ss:$16 sps:$4 sm:$0xff]  }
  0x65   :  { %3658 = vmatpush2.bf16.msra.mxu0 %v5815_v38  ;;  %v5874_v15 = vld [vmem:[#allocation2 + $0x6a4] ss:$16 sps:$4 sm:$0xff]   ;;  %v5872_v17 = vld [vmem:[#allocation2 + $0x6a0] ss:$16 sps:$4 sm:$0xff]  }
  0x66   :  { %3699 = vmatpush2.bf16.msra.mxu1 %v5816_v39  ;;  %3659 = vmatprep.subr.bf16.mxu0 %v5817_v40  ;;  %v5877_v18 = vld [vmem:[#allocation2 + $0x484] ss:$16 sps:$4 sm:$0xff]   ;;  %v5875_v20 = vld [vmem:[#allocation2 + $0x480] ss:$16 sps:$4 sm:$0xff]  }
  0x67   :  { %3700 = vmatprep.subr.bf16.mxu1 %v5819_v41  ;;  %v5880_v19 = vld [vmem:[#allocation2 + $0x684] ss:$16 sps:$4 sm:$0xff]   ;;  %v5878_v21 = vld [vmem:[#allocation2 + $0x680] ss:$16 sps:$4 sm:$0xff]  }
  0x68   :  { %v5883_v22 = vld [vmem:[#allocation2 + $0x464] ss:$16 sps:$4 sm:$0xff]   ;;  %v5881_v24 = vld [vmem:[#allocation2 + $0x460] ss:$16 sps:$4 sm:$0xff]  }
  0x69   :  { %3660 = vmatpush2.bf16.msra.mxu0 %v5821_v42  ;;  %v5886_v23 = vld [vmem:[#allocation2 + $0x664] ss:$16 sps:$4 sm:$0xff]   ;;  %v5884_v25 = vld [vmem:[#allocation2 + $0x660] ss:$16 sps:$4 sm:$0xff]  }
  0x6a   :  { %3701 = vmatpush2.bf16.msra.mxu1 %v5822_v43  ;;  %3661 = vmatprep.subr.bf16.mxu0 %v5823_v44  ;;  %v5889_v26 = vld [vmem:[#allocation2 + $0x444] ss:$16 sps:$4 sm:$0xff]   ;;  %v5887_v28 = vld [vmem:[#allocation2 + $0x440] ss:$16 sps:$4 sm:$0xff]  }
  0x6b   :  { %3702 = vmatprep.subr.bf16.mxu1 %v5825_v45  ;;  %v5892_v27 = vld [vmem:[#allocation2 + $0x644] ss:$16 sps:$4 sm:$0xff]   ;;  %v5890_v29 = vld [vmem:[#allocation2 + $0x640] ss:$16 sps:$4 sm:$0xff]  }
  0x6c   :  { %v5895_v30 = vld [vmem:[#allocation2 + $0x424] ss:$16 sps:$4 sm:$0xff]   ;;  %v5893_v34 = vld [vmem:[#allocation2 + $0x420] ss:$16 sps:$4 sm:$0xff]  }
  0x6d   :  { %3662 = vmatpush2.bf16.msra.mxu0 %v5827_v49  ;;  %v5898_v31 = vld [vmem:[#allocation2 + $0x624] ss:$16 sps:$4 sm:$0xff]   ;;  %v5896_v35 = vld [vmem:[#allocation2 + $0x620] ss:$16 sps:$4 sm:$0xff]  }
  0x6e   :  { %3703 = vmatpush2.bf16.msra.mxu1 %v5828_v50  ;;  %3663 = vmatprep.subr.bf16.mxu0 %v5829_v52  ;;  %v6943_v32 = vld [vmem:[%s7170_s0 + $0x10] sm:$0xff] }
  0x6f   :  { %3704 = vmatprep.subr.bf16.mxu1 %v5831_v53  ;;  %v6952_v36 = vcombine.high %v6943_v32, %v6943_v32  ;;  %v5901_v38 = vld [vmem:[#allocation2 + $0x404] ss:$16 sps:$4 sm:$0xff]   ;;  %v5899_v40 = vld [vmem:[#allocation2 + $0x400] ss:$16 sps:$4 sm:$0xff]  }
  0x70   :  { %v5904_v39 = vld [vmem:[#allocation2 + $0x604] ss:$16 sps:$4 sm:$0xff]   ;;  %v5902_v41 = vld [vmem:[#allocation2 + $0x600] ss:$16 sps:$4 sm:$0xff]  }
  0x71   :  { %3664 = vmatpush2.bf16.msra.mxu0 %v5833_v54  ;;  %v5907_v42 = vld [vmem:[#allocation2 + $0x5e4] ss:$16 sps:$4 sm:$0xff]   ;;  %v5905_v44 = vld [vmem:[#allocation2 + $0x5e0] ss:$16 sps:$4 sm:$0xff]  }
  0x72   :  { %3705 = vmatpush2.bf16.msra.mxu1 %v5834_v55  ;;  %3665 = vmatprep.subr.bf16.mxu0 %v5835_v56  ;;  %v5910_v43 = vld [vmem:[#allocation2 + $0x7e4] ss:$16 sps:$4 sm:$0xff]   ;;  %v5908_v45 = vld [vmem:[#allocation2 + $0x7e0] ss:$16 sps:$4 sm:$0xff]  }
  0x73   :  { %3706 = vmatprep.subr.bf16.mxu1 %v5837_v57  ;;  %v5913_v46 = vld [vmem:[#allocation2 + $0x5c4] ss:$16 sps:$4 sm:$0xff]   ;;  %v5911_v49 = vld [vmem:[#allocation2 + $0x5c0] ss:$16 sps:$4 sm:$0xff]  }
  0x74   :  { %v5916_v48 = vld [vmem:[#allocation2 + $0x7c4] ss:$16 sps:$4 sm:$0xff]   ;;  %v5914_v50 = vld [vmem:[#allocation2 + $0x7c0] ss:$16 sps:$4 sm:$0xff]  }
  0x75   :  { %3666 = vmatpush2.bf16.msra.mxu0 %v5839_v58  ;;  %v5919_v52 = vld [vmem:[#allocation2 + $0x5a4] ss:$16 sps:$4 sm:$0xff]   ;;  %v5917_v54 = vld [vmem:[#allocation2 + $0x5a0] ss:$16 sps:$4 sm:$0xff]  }
  0x76   :  { %3707 = vmatpush2.bf16.msra.mxu1 %v5840_v59  ;;  %3667 = vmatprep.subr.bf16.mxu0 %v5841_v60  ;;  %v5922_v53 = vld [vmem:[#allocation2 + $0x7a4] ss:$16 sps:$4 sm:$0xff]   ;;  %v5920_v55 = vld [vmem:[#allocation2 + $0x7a0] ss:$16 sps:$4 sm:$0xff]  }
  0x77   :  { %3708 = vmatprep.subr.bf16.mxu1 %v5843_v61  ;;  %v5925_v56 = vld [vmem:[#allocation2 + $0x584] ss:$16 sps:$4 sm:$0xff]   ;;  %v5923_v58 = vld [vmem:[#allocation2 + $0x580] ss:$16 sps:$4 sm:$0xff]  }
  0x78   :  { %v5928_v57 = vld [vmem:[#allocation2 + $0x784] ss:$16 sps:$4 sm:$0xff]   ;;  %v5926_v59 = vld [vmem:[#allocation2 + $0x780] ss:$16 sps:$4 sm:$0xff]  }
  0x79   :  { %3668 = vmatpush2.bf16.msra.mxu0 %v5845_v62  ;;  %v5931_v60 = vld [vmem:[#allocation2 + $0x564] ss:$16 sps:$4 sm:$0xff]   ;;  %v5929_v62 = vld [vmem:[#allocation2 + $0x560] ss:$16 sps:$4 sm:$0xff]  }
  0x7a   :  { %3709 = vmatpush2.bf16.msra.mxu1 %v5846_v63  ;;  %3669 = vmatprep.subr.bf16.mxu0 %v5847_v0  ;;  %v5934_v61 = vld [vmem:[#allocation2 + $0x764] ss:$16 sps:$4 sm:$0xff]   ;;  %v5932_v63 = vld [vmem:[#allocation2 + $0x760] ss:$16 sps:$4 sm:$0xff]  }
  0x7b   :  { %3710 = vmatprep.subr.bf16.mxu1 %v5849_v1  ;;  %v5937_v0 = vld [vmem:[#allocation2 + $0x544] ss:$16 sps:$4 sm:$0xff]  }
  0x7c   :  { %v5940_v1 = vld [vmem:[#allocation2 + $0x744] ss:$16 sps:$4 sm:$0xff]  }
  0x7d   :  { %3670 = vmatpush2.bf16.msra.mxu0 %v5851_v2  ;;  %v5935_v2 = vld [vmem:[#allocation2 + $0x540] ss:$16 sps:$4 sm:$0xff]  }
  0x7e   :  { %3711 = vmatpush2.bf16.msra.mxu1 %v5852_v3  ;;  %3721 = vmatprep.subr.bf16.mxu0 %v5859_v4  ;;  %v5938_v3 = vld [vmem:[#allocation2 + $0x740] ss:$16 sps:$4 sm:$0xff]   ;;  %v5943_v4 = vld [vmem:[#allocation2 + $0x524] ss:$16 sps:$4 sm:$0xff]  }
  0x7f   :  { %3762 = vmatprep.subr.bf16.mxu1 %v5862_v5  ;;  %v5946_v5 = vld [vmem:[#allocation2 + $0x724] ss:$16 sps:$4 sm:$0xff]  }
  0x80   :  { %3672 = vmatmul.mubr.bf16.vlgmr.msra.gmra.mxu0 %v6934_v6 }
  0x81   :  { %3713 = vmatmul.mubr.bf16.vlgmr.msra.gmra.mxu1 %v6936_v7  ;;  %3722 = vmatpush1.bf16.msra.mxu0 %v5857_v8  ;;  %v5941_v8 = vld [vmem:[#allocation2 + $0x520] ss:$16 sps:$4 sm:$0xff]  }
  0x82   :  { %3763 = vmatpush1.bf16.msra.mxu1 %v5860_v9  ;;  %3723 = vmatprep.subr.bf16.mxu0 %v5865_v10  ;;  %v5944_v9 = vld [vmem:[#allocation2 + $0x720] ss:$16 sps:$4 sm:$0xff]   ;;  %v5949_v10 = vld [vmem:[#allocation2 + $0x504] ss:$16 sps:$4 sm:$0xff]  }
  0x83   :  { %3764 = vmatprep.subr.bf16.mxu1 %v5868_v11  ;;  %3753 = vmatprep.mubr.bf16.mxu0 %v6952_v36  ;;  %v5952_v11 = vld [vmem:[#allocation2 + $0x704] ss:$16 sps:$4 sm:$0xff]  }
  0x84   :  { %3794 = vmatprep.mubr.bf16.mxu1 %v6956_v37 }
  0x85   :  { %3724 = vmatpush1.bf16.msra.mxu0 %v5863_v12  ;;  %v5947_v12 = vld [vmem:[#allocation2 + $0x500] ss:$16 sps:$4 sm:$0xff]  }
  0x86   :  { %3765 = vmatpush1.bf16.msra.mxu1 %v5866_v13  ;;  %3725 = vmatprep.subr.bf16.mxu0 %v5871_v14  ;;  %v5950_v13 = vld [vmem:[#allocation2 + $0x700] ss:$16 sps:$4 sm:$0xff]   ;;  %v5959_v14 = vld [vmem:[#allocation2 + $0x8e4] ss:$16 sps:$4 sm:$0xff]  }
  0x87   :  { %3766 = vmatprep.subr.bf16.mxu1 %v5874_v15  ;;  %v5962_v15 = vld [vmem:[#allocation2 + $0xae4] ss:$16 sps:$4 sm:$0xff]  }
  0x89   :  { %3726 = vmatpush1.bf16.msra.mxu0 %v5869_v16  ;;  %v6962_v16 = vcombine.low %v6943_v32, %v6943_v32  ;;  %v5977_v32 = vld [vmem:[#allocation2 + $0x884] ss:$16 sps:$4 sm:$0xff]  }
  0x8a   :  { %3767 = vmatpush1.bf16.msra.mxu1 %v5872_v17  ;;  %3727 = vmatprep.subr.bf16.mxu0 %v5877_v18  ;;  %v6966_v17 = vcombine.low %v6948_v33, %v6948_v33  ;;  %v5957_v18 = vld [vmem:[#allocation2 + $0x8e0] ss:$16 sps:$4 sm:$0xff]   ;;  %v5980_v33 = vld [vmem:[#allocation2 + $0xa84] ss:$16 sps:$4 sm:$0xff]  }
  0x8b   :  { %3768 = vmatprep.subr.bf16.mxu1 %v5880_v19  ;;  %v5960_v19 = vld [vmem:[#allocation2 + $0xae0] ss:$16 sps:$4 sm:$0xff]  }
  0x8d   :  { %3728 = vmatpush1.bf16.msra.mxu0 %v5875_v20  ;;  %v5965_v20 = vld [vmem:[#allocation2 + $0x8c4] ss:$16 sps:$4 sm:$0xff]  }
  0x8e   :  { %3769 = vmatpush1.bf16.msra.mxu1 %v5878_v21  ;;  %3729 = vmatprep.subr.bf16.mxu0 %v5883_v22  ;;  %v5968_v21 = vld [vmem:[#allocation2 + $0xac4] ss:$16 sps:$4 sm:$0xff]  }
  0x8f   :  { %3770 = vmatprep.subr.bf16.mxu1 %v5886_v23  ;;  %v6971_v22 = vld [vmem:[%s7170_s0 + $0x20] sm:$0xff]  ;;  %v6976_v23 = vld [vmem:[%s7170_s0 + $0x28] sm:$0xff] }
  0x91   :  { %3730 = vmatpush1.bf16.msra.mxu0 %v5881_v24  ;;  %v6980_v24 = vcombine.high %v6971_v22, %v6971_v22 }
  0x92   :  { %3771 = vmatpush1.bf16.msra.mxu1 %v5884_v25  ;;  %3731 = vmatprep.subr.bf16.mxu0 %v5889_v26  ;;  %v6984_v25 = vcombine.high %v6976_v23, %v6976_v23  ;;  %v5963_v26 = vld [vmem:[#allocation2 + $0x8c0] ss:$16 sps:$4 sm:$0xff]  }
  0x93   :  { %3772 = vmatprep.subr.bf16.mxu1 %v5892_v27  ;;  %v5966_v27 = vld [vmem:[#allocation2 + $0xac0] ss:$16 sps:$4 sm:$0xff]  }
  0x95   :  { %3732 = vmatpush1.bf16.msra.mxu0 %v5887_v28  ;;  %v5971_v28 = vld [vmem:[#allocation2 + $0x8a4] ss:$16 sps:$4 sm:$0xff]  }
  0x96   :  { %3773 = vmatpush1.bf16.msra.mxu1 %v5890_v29  ;;  %3733 = vmatprep.subr.bf16.mxu0 %v5895_v30  ;;  %v5974_v29 = vld [vmem:[#allocation2 + $0xaa4] ss:$16 sps:$4 sm:$0xff]   ;;  %v5969_v30 = vld [vmem:[#allocation2 + $0x8a0] ss:$16 sps:$4 sm:$0xff]  }
  0x97   :  { %3774 = vmatprep.subr.bf16.mxu1 %v5898_v31  ;;  %v5972_v31 = vld [vmem:[#allocation2 + $0xaa0] ss:$16 sps:$4 sm:$0xff]  }
  0x99   :  { %3734 = vmatpush1.bf16.msra.mxu0 %v5893_v34  ;;  %v5975_v34 = vld [vmem:[#allocation2 + $0x880] ss:$16 sps:$4 sm:$0xff]  }
  0x9a   :  { %3775 = vmatpush1.bf16.msra.mxu1 %v5896_v35  ;;  %3735 = vmatprep.subr.bf16.mxu0 %v5901_v38  ;;  %v5978_v35 = vld [vmem:[#allocation2 + $0xa80] ss:$16 sps:$4 sm:$0xff]   ;;  %v5983_v38 = vld [vmem:[#allocation2 + $0x864] ss:$16 sps:$4 sm:$0xff]  }
  0x9b   :  { %3776 = vmatprep.subr.bf16.mxu1 %v5904_v39  ;;  %v5986_v39 = vld [vmem:[#allocation2 + $0xa64] ss:$16 sps:$4 sm:$0xff]  }
  0x9d   :  { %3736 = vmatpush1.bf16.msra.mxu0 %v5899_v40  ;;  %v5981_v40 = vld [vmem:[#allocation2 + $0x860] ss:$16 sps:$4 sm:$0xff]  }
  0x9e   :  { %3777 = vmatpush1.bf16.msra.mxu1 %v5902_v41  ;;  %3737 = vmatprep.subr.bf16.mxu0 %v5907_v42  ;;  %v5984_v41 = vld [vmem:[#allocation2 + $0xa60] ss:$16 sps:$4 sm:$0xff]   ;;  %v5989_v42 = vld [vmem:[#allocation2 + $0x844] ss:$16 sps:$4 sm:$0xff]  }
  0x9f   :  { %3778 = vmatprep.subr.bf16.mxu1 %v5910_v43  ;;  %v5992_v43 = vld [vmem:[#allocation2 + $0xa44] ss:$16 sps:$4 sm:$0xff]  }
  0xa1   :  { %3738 = vmatpush2.bf16.msra.mxu0 %v5905_v44  ;;  %v5987_v44 = vld [vmem:[#allocation2 + $0x840] ss:$16 sps:$4 sm:$0xff]  }
  0xa2   :  { %3779 = vmatpush2.bf16.msra.mxu1 %v5908_v45  ;;  %3739 = vmatprep.subr.bf16.mxu0 %v5913_v46  ;;  %v5990_v45 = vld [vmem:[#allocation2 + $0xa40] ss:$16 sps:$4 sm:$0xff]   ;;  %v5995_v46 = vld [vmem:[#allocation2 + $0x824] ss:$16 sps:$4 sm:$0xff]  }
  0xa3   :  { %3780 = vmatprep.subr.bf16.mxu1 %v5916_v48  ;;  %v5998_v48 = vld [vmem:[#allocation2 + $0xa24] ss:$16 sps:$4 sm:$0xff]  }
  0xa5   :  { %3740 = vmatpush2.bf16.msra.mxu0 %v5911_v49  ;;  %v5993_v49 = vld [vmem:[#allocation2 + $0x820] ss:$16 sps:$4 sm:$0xff]  }
  0xa6   :  { %3781 = vmatpush2.bf16.msra.mxu1 %v5914_v50  ;;  %3741 = vmatprep.subr.bf16.mxu0 %v5919_v52  ;;  %v5996_v50 = vld [vmem:[#allocation2 + $0xa20] ss:$16 sps:$4 sm:$0xff]   ;;  %v6001_v52 = vld [vmem:[#allocation2 + $0x804] ss:$16 sps:$4 sm:$0xff]  }
  0xa7   :  { %3782 = vmatprep.subr.bf16.mxu1 %v5922_v53  ;;  %v6004_v53 = vld [vmem:[#allocation2 + $0xa04] ss:$16 sps:$4 sm:$0xff]  }
  0xa9   :  { %3742 = vmatpush2.bf16.msra.mxu0 %v5917_v54  ;;  %v5999_v54 = vld [vmem:[#allocation2 + $0x800] ss:$16 sps:$4 sm:$0xff]  }
  0xaa   :  { %3783 = vmatpush2.bf16.msra.mxu1 %v5920_v55  ;;  %3743 = vmatprep.subr.bf16.mxu0 %v5925_v56  ;;  %v6002_v55 = vld [vmem:[#allocation2 + $0xa00] ss:$16 sps:$4 sm:$0xff]   ;;  %v6007_v56 = vld [vmem:[#allocation2 + $0x9e4] ss:$16 sps:$4 sm:$0xff]  }
  0xab   :  { %3784 = vmatprep.subr.bf16.mxu1 %v5928_v57  ;;  %v6010_v57 = vld [vmem:[#allocation2 + $0xbe4] ss:$16 sps:$4 sm:$0xff]  }
  0xad   :  { %3744 = vmatpush2.bf16.msra.mxu0 %v5923_v58  ;;  %v6005_v58 = vld [vmem:[#allocation2 + $0x9e0] ss:$16 sps:$4 sm:$0xff]  }
  0xae   :  { %3785 = vmatpush2.bf16.msra.mxu1 %v5926_v59  ;;  %3745 = vmatprep.subr.bf16.mxu0 %v5931_v60  ;;  %v6008_v59 = vld [vmem:[#allocation2 + $0xbe0] ss:$16 sps:$4 sm:$0xff]   ;;  %v6013_v60 = vld [vmem:[#allocation2 + $0x9c4] ss:$16 sps:$4 sm:$0xff]  }
  0xaf   :  { %3786 = vmatprep.subr.bf16.mxu1 %v5934_v61  ;;  %v6016_v61 = vld [vmem:[#allocation2 + $0xbc4] ss:$16 sps:$4 sm:$0xff]  }
  0xb1   :  { %3746 = vmatpush2.bf16.msra.mxu0 %v5929_v62  ;;  %v6011_v62 = vld [vmem:[#allocation2 + $0x9c0] ss:$16 sps:$4 sm:$0xff]  }
  0xb2   :  { %3787 = vmatpush2.bf16.msra.mxu1 %v5932_v63  ;;  %3747 = vmatprep.subr.bf16.mxu0 %v5937_v0  ;;  %v6014_v63 = vld [vmem:[#allocation2 + $0xbc0] ss:$16 sps:$4 sm:$0xff]   ;;  %v6019_v0 = vld [vmem:[#allocation2 + $0x9a4] ss:$16 sps:$4 sm:$0xff]  }
  0xb3   :  { %3788 = vmatprep.subr.bf16.mxu1 %v5940_v1  ;;  %v6022_v1 = vld [vmem:[#allocation2 + $0xba4] ss:$16 sps:$4 sm:$0xff]  }
  0xb5   :  { %3748 = vmatpush2.bf16.msra.mxu0 %v5935_v2  ;;  %v6017_v2 = vld [vmem:[#allocation2 + $0x9a0] ss:$16 sps:$4 sm:$0xff]  }
  0xb6   :  { %3789 = vmatpush2.bf16.msra.mxu1 %v5938_v3  ;;  %3749 = vmatprep.subr.bf16.mxu0 %v5943_v4  ;;  %v6020_v3 = vld [vmem:[#allocation2 + $0xba0] ss:$16 sps:$4 sm:$0xff]   ;;  %v6025_v4 = vld [vmem:[#allocation2 + $0x984] ss:$16 sps:$4 sm:$0xff]  }
  0xb7   :  { %3790 = vmatprep.subr.bf16.mxu1 %v5946_v5  ;;  %v6028_v5 = vld [vmem:[#allocation2 + $0xb84] ss:$16 sps:$4 sm:$0xff]  }
  0xb9   :  { %3750 = vmatpush2.bf16.msra.mxu0 %v5941_v8  ;;  %v6023_v8 = vld [vmem:[#allocation2 + $0x980] ss:$16 sps:$4 sm:$0xff]  }
  0xba   :  { %3791 = vmatpush2.bf16.msra.mxu1 %v5944_v9  ;;  %3751 = vmatprep.subr.bf16.mxu0 %v5949_v10  ;;  %v6026_v9 = vld [vmem:[#allocation2 + $0xb80] ss:$16 sps:$4 sm:$0xff]   ;;  %v6031_v10 = vld [vmem:[#allocation2 + $0x964] ss:$16 sps:$4 sm:$0xff]  }
  0xbb   :  { %3792 = vmatprep.subr.bf16.mxu1 %v5952_v11  ;;  %v6034_v11 = vld [vmem:[#allocation2 + $0xb64] ss:$16 sps:$4 sm:$0xff]  }
  0xbd   :  { %3752 = vmatpush2.bf16.msra.mxu0 %v5947_v12  ;;  %v6029_v12 = vld [vmem:[#allocation2 + $0x960] ss:$16 sps:$4 sm:$0xff]  }
  0xbe   :  { %3793 = vmatpush2.bf16.msra.mxu1 %v5950_v13  ;;  %3803 = vmatprep.subr.bf16.mxu0 %v5959_v14  ;;  %v6032_v13 = vld [vmem:[#allocation2 + $0xb60] ss:$16 sps:$4 sm:$0xff]   ;;  %v6037_v14 = vld [vmem:[#allocation2 + $0x944] ss:$16 sps:$4 sm:$0xff]  }
  0xbf   :  { %3844 = vmatprep.subr.bf16.mxu1 %v5962_v15  ;;  %v6040_v15 = vld [vmem:[#allocation2 + $0xb44] ss:$16 sps:$4 sm:$0xff]  }
  0xc0   :  { %3754 = vmatmul.mubr.bf16.vlgmr.msra.gmra.mxu0 %v6962_v16 }
  0xc1   :  { %3795 = vmatmul.mubr.bf16.vlgmr.msra.gmra.mxu1 %v6966_v17  ;;  %3804 = vmatpush1.bf16.msra.mxu0 %v5957_v18  ;;  %v6035_v18 = vld [vmem:[#allocation2 + $0x940] ss:$16 sps:$4 sm:$0xff]  }
  0xc2   :  { %3845 = vmatpush1.bf16.msra.mxu1 %v5960_v19  ;;  %3805 = vmatprep.subr.bf16.mxu0 %v5965_v20  ;;  %v6038_v19 = vld [vmem:[#allocation2 + $0xb40] ss:$16 sps:$4 sm:$0xff]   ;;  %v6043_v20 = vld [vmem:[#allocation2 + $0x924] ss:$16 sps:$4 sm:$0xff]  }
  0xc3   :  { %3846 = vmatprep.subr.bf16.mxu1 %v5968_v21  ;;  %3835 = vmatprep.mubr.bf16.mxu0 %v6980_v24  ;;  %v6046_v21 = vld [vmem:[#allocation2 + $0xb24] ss:$16 sps:$4 sm:$0xff]  }
  0xc4   :  { %3876 = vmatprep.mubr.bf16.mxu1 %v6984_v25 }
  0xc5   :  { %3806 = vmatpush1.bf16.msra.mxu0 %v5963_v26  ;;  %v6041_v26 = vld [vmem:[#allocation2 + $0x920] ss:$16 sps:$4 sm:$0xff]  }
  0xc6   :  { %3847 = vmatpush1.bf16.msra.mxu1 %v5966_v27  ;;  %3807 = vmatprep.subr.bf16.mxu0 %v5971_v28  ;;  %v6044_v27 = vld [vmem:[#allocation2 + $0xb20] ss:$16 sps:$4 sm:$0xff]   ;;  %v6049_v28 = vld [vmem:[#allocation2 + $0x904] ss:$16 sps:$4 sm:$0xff]  }
  0xc7   :  { %3848 = vmatprep.subr.bf16.mxu1 %v5974_v29  ;;  %v6052_v29 = vld [vmem:[#allocation2 + $0xb04] ss:$16 sps:$4 sm:$0xff]  }
  0xc9   :  { %3808 = vmatpush1.bf16.msra.mxu0 %v5969_v30  ;;  %v6047_v30 = vld [vmem:[#allocation2 + $0x900] ss:$16 sps:$4 sm:$0xff]  }
  0xca   :  { %3849 = vmatpush1.bf16.msra.mxu1 %v5972_v31  ;;  %3809 = vmatprep.subr.bf16.mxu0 %v5977_v32  ;;  %v6050_v31 = vld [vmem:[#allocation2 + $0xb00] ss:$16 sps:$4 sm:$0xff]   ;;  %v6059_v32 = vld [vmem:[#allocation2 + $0xce4] ss:$16 sps:$4 sm:$0xff]  }
  0xcb   :  { %3850 = vmatprep.subr.bf16.mxu1 %v5980_v33  ;;  %v6062_v33 = vld [vmem:[#allocation2 + $0xee4] ss:$16 sps:$4 sm:$0xff]  }
  0xcd   :  { %3810 = vmatpush1.bf16.msra.mxu0 %v5975_v34  ;;  %v6057_v34 = vld [vmem:[#allocation2 + $0xce0] ss:$16 sps:$4 sm:$0xff]  }
  0xce   :  { %3851 = vmatpush1.bf16.msra.mxu1 %v5978_v35  ;;  %3811 = vmatprep.subr.bf16.mxu0 %v5983_v38  ;;  %v6993_v35 = vld [vmem:[%s7170_s0 + $0x30] sm:$0xff]  ;;  %v6997_v38 = vcombine.low %v6971_v22, %v6971_v22 }
  0xcf   :  { %3852 = vmatprep.subr.bf16.mxu1 %v5986_v39  ;;  %v7001_v39 = vcombine.low %v6976_v23, %v6976_v23  ;;  %v7010_v22 = vcombine.high %v6993_v35, %v6993_v35 }
  0xd1   :  { %3812 = vmatpush1.bf16.msra.mxu0 %v5981_v40  ;;  %v7006_v40 = vld [vmem:[%s7170_s0 + $0x38] sm:$0xff] }
  0xd2   :  { %3853 = vmatpush1.bf16.msra.mxu1 %v5984_v41  ;;  %3813 = vmatprep.subr.bf16.mxu0 %v5989_v42  ;;  %v6060_v41 = vld [vmem:[#allocation2 + $0xee0] ss:$16 sps:$4 sm:$0xff]   ;;  %v6065_v42 = vld [vmem:[#allocation2 + $0xcc4] ss:$16 sps:$4 sm:$0xff]   ;;  %v7014_v23 = vcombine.high %v7006_v40, %v7006_v40 }
  0xd3   :  { %3854 = vmatprep.subr.bf16.mxu1 %v5992_v43  ;;  %v6068_v43 = vld [vmem:[#allocation2 + $0xec4] ss:$16 sps:$4 sm:$0xff]  }
  0xd5   :  { %3814 = vmatpush1.bf16.msra.mxu0 %v5987_v44  ;;  %v6063_v44 = vld [vmem:[#allocation2 + $0xcc0] ss:$16 sps:$4 sm:$0xff]  }
  0xd6   :  { %3855 = vmatpush1.bf16.msra.mxu1 %v5990_v45  ;;  %3815 = vmatprep.subr.bf16.mxu0 %v5995_v46  ;;  %v6066_v45 = vld [vmem:[#allocation2 + $0xec0] ss:$16 sps:$4 sm:$0xff]   ;;  %v6071_v46 = vld [vmem:[#allocation2 + $0xca4] ss:$16 sps:$4 sm:$0xff]  }
  0xd7   :  { %3856 = vmatprep.subr.bf16.mxu1 %v5998_v48  ;;  %v6074_v48 = vld [vmem:[#allocation2 + $0xea4] ss:$16 sps:$4 sm:$0xff]  }
  0xd9   :  { %3816 = vmatpush1.bf16.msra.mxu0 %v5993_v49  ;;  %v6069_v49 = vld [vmem:[#allocation2 + $0xca0] ss:$16 sps:$4 sm:$0xff]  }
  0xda   :  { %3857 = vmatpush1.bf16.msra.mxu1 %v5996_v50  ;;  %3817 = vmatprep.subr.bf16.mxu0 %v6001_v52  ;;  %v6072_v50 = vld [vmem:[#allocation2 + $0xea0] ss:$16 sps:$4 sm:$0xff]   ;;  %v6077_v52 = vld [vmem:[#allocation2 + $0xc84] ss:$16 sps:$4 sm:$0xff]  }
  0xdb   :  { %3858 = vmatprep.subr.bf16.mxu1 %v6004_v53  ;;  %v6080_v53 = vld [vmem:[#allocation2 + $0xe84] ss:$16 sps:$4 sm:$0xff]  }
  0xdd   :  { %3818 = vmatpush1.bf16.msra.mxu0 %v5999_v54  ;;  %v6075_v54 = vld [vmem:[#allocation2 + $0xc80] ss:$16 sps:$4 sm:$0xff]  }
  0xde   :  { %3859 = vmatpush1.bf16.msra.mxu1 %v6002_v55  ;;  %3819 = vmatprep.subr.bf16.mxu0 %v6007_v56  ;;  %v6078_v55 = vld [vmem:[#allocation2 + $0xe80] ss:$16 sps:$4 sm:$0xff]   ;;  %v6083_v56 = vld [vmem:[#allocation2 + $0xc64] ss:$16 sps:$4 sm:$0xff]  }
  0xdf   :  { %3860 = vmatprep.subr.bf16.mxu1 %v6010_v57  ;;  %v6086_v57 = vld [vmem:[#allocation2 + $0xe64] ss:$16 sps:$4 sm:$0xff]  }
  0xe1   :  { %3820 = vmatpush2.bf16.msra.mxu0 %v6005_v58  ;;  %v6081_v58 = vld [vmem:[#allocation2 + $0xc60] ss:$16 sps:$4 sm:$0xff]  }
  0xe2   :  { %3861 = vmatpush2.bf16.msra.mxu1 %v6008_v59  ;;  %3821 = vmatprep.subr.bf16.mxu0 %v6013_v60  ;;  %v6084_v59 = vld [vmem:[#allocation2 + $0xe60] ss:$16 sps:$4 sm:$0xff]   ;;  %v6089_v60 = vld [vmem:[#allocation2 + $0xc44] ss:$16 sps:$4 sm:$0xff]  }
  0xe3   :  { %3862 = vmatprep.subr.bf16.mxu1 %v6016_v61  ;;  %v6092_v61 = vld [vmem:[#allocation2 + $0xe44] ss:$16 sps:$4 sm:$0xff]  }
  0xe5   :  { %3822 = vmatpush2.bf16.msra.mxu0 %v6011_v62  ;;  %v6087_v62 = vld [vmem:[#allocation2 + $0xc40] ss:$16 sps:$4 sm:$0xff]  }
  0xe6   :  { %3863 = vmatpush2.bf16.msra.mxu1 %v6014_v63  ;;  %3823 = vmatprep.subr.bf16.mxu0 %v6019_v0  ;;  %v6090_v63 = vld [vmem:[#allocation2 + $0xe40] ss:$16 sps:$4 sm:$0xff]   ;;  %v6095_v0 = vld [vmem:[#allocation2 + $0xc24] ss:$16 sps:$4 sm:$0xff]  }
  0xe7   :  { %3864 = vmatprep.subr.bf16.mxu1 %v6022_v1  ;;  %v6098_v1 = vld [vmem:[#allocation2 + $0xe24] ss:$16 sps:$4 sm:$0xff]  }
  0xe9   :  { %3824 = vmatpush2.bf16.msra.mxu0 %v6017_v2  ;;  %v6093_v2 = vld [vmem:[#allocation2 + $0xc20] ss:$16 sps:$4 sm:$0xff]  }
  0xea   :  { %3865 = vmatpush2.bf16.msra.mxu1 %v6020_v3  ;;  %3825 = vmatprep.subr.bf16.mxu0 %v6025_v4  ;;  %v6096_v3 = vld [vmem:[#allocation2 + $0xe20] ss:$16 sps:$4 sm:$0xff]   ;;  %v6101_v4 = vld [vmem:[#allocation2 + $0xc04] ss:$16 sps:$4 sm:$0xff]  }
  0xeb   :  { %3866 = vmatprep.subr.bf16.mxu1 %v6028_v5  ;;  %v6104_v5 = vld [vmem:[#allocation2 + $0xe04] ss:$16 sps:$4 sm:$0xff]  }
  0xed   :  { %3826 = vmatpush2.bf16.msra.mxu0 %v6023_v8  ;;  %v6099_v8 = vld [vmem:[#allocation2 + $0xc00] ss:$16 sps:$4 sm:$0xff]  }
  0xee   :  { %3867 = vmatpush2.bf16.msra.mxu1 %v6026_v9  ;;  %3827 = vmatprep.subr.bf16.mxu0 %v6031_v10  ;;  %v6102_v9 = vld [vmem:[#allocation2 + $0xe00] ss:$16 sps:$4 sm:$0xff]   ;;  %v6107_v10 = vld [vmem:[#allocation2 + $0xde4] ss:$16 sps:$4 sm:$0xff]  }
  0xef   :  { %3868 = vmatprep.subr.bf16.mxu1 %v6034_v11  ;;  %v6110_v11 = vld [vmem:[#allocation2 + $0xfe4] ss:$16 sps:$4 sm:$0xff]  }
  0xf1   :  { %3828 = vmatpush2.bf16.msra.mxu0 %v6029_v12  ;;  %v6105_v12 = vld [vmem:[#allocation2 + $0xde0] ss:$16 sps:$4 sm:$0xff]  }
  0xf2   :  { %3869 = vmatpush2.bf16.msra.mxu1 %v6032_v13  ;;  %3829 = vmatprep.subr.bf16.mxu0 %v6037_v14  ;;  %v6108_v13 = vld [vmem:[#allocation2 + $0xfe0] ss:$16 sps:$4 sm:$0xff]   ;;  %v6113_v14 = vld [vmem:[#allocation2 + $0xdc4] ss:$16 sps:$4 sm:$0xff]  }
  0xf3   :  { %3870 = vmatprep.subr.bf16.mxu1 %v6040_v15  ;;  %v6116_v15 = vld [vmem:[#allocation2 + $0xfc4] ss:$16 sps:$4 sm:$0xff]  }
  0xf5   :  { %3830 = vmatpush2.bf16.msra.mxu0 %v6035_v18  ;;  %v6111_v18 = vld [vmem:[#allocation2 + $0xdc0] ss:$16 sps:$4 sm:$0xff]  }
  0xf6   :  { %3871 = vmatpush2.bf16.msra.mxu1 %v6038_v19  ;;  %3831 = vmatprep.subr.bf16.mxu0 %v6043_v20  ;;  %v6114_v19 = vld [vmem:[#allocation2 + $0xfc0] ss:$16 sps:$4 sm:$0xff]   ;;  %v6119_v20 = vld [vmem:[#allocation2 + $0xda4] ss:$16 sps:$4 sm:$0xff]  }
  0xf7   :  { %3872 = vmatprep.subr.bf16.mxu1 %v6046_v21  ;;  %v6122_v21 = vld [vmem:[#allocation2 + $0xfa4] ss:$16 sps:$4 sm:$0xff]  }
  0xf9   :  { %3832 = vmatpush2.bf16.msra.mxu0 %v6041_v26  ;;  %v6117_v26 = vld [vmem:[#allocation2 + $0xda0] ss:$16 sps:$4 sm:$0xff]  }
  0xfa   :  { %3873 = vmatpush2.bf16.msra.mxu1 %v6044_v27  ;;  %3833 = vmatprep.subr.bf16.mxu0 %v6049_v28  ;;  %v6120_v27 = vld [vmem:[#allocation2 + $0xfa0] ss:$16 sps:$4 sm:$0xff]   ;;  %v6125_v28 = vld [vmem:[#allocation2 + $0xd84] ss:$16 sps:$4 sm:$0xff]  }
  0xfb   :  { %3874 = vmatprep.subr.bf16.mxu1 %v6052_v29  ;;  %v6128_v29 = vld [vmem:[#allocation2 + $0xf84] ss:$16 sps:$4 sm:$0xff]  }
  0xfd   :  { %3834 = vmatpush2.bf16.msra.mxu0 %v6047_v30  ;;  %v6123_v30 = vld [vmem:[#allocation2 + $0xd80] ss:$16 sps:$4 sm:$0xff]  }
  0xfe   :  { %3875 = vmatpush2.bf16.msra.mxu1 %v6050_v31  ;;  %3885 = vmatprep.subr.bf16.mxu0 %v6059_v32  ;;  %v6126_v31 = vld [vmem:[#allocation2 + $0xf80] ss:$16 sps:$4 sm:$0xff]   ;;  %v6131_v32 = vld [vmem:[#allocation2 + $0xd64] ss:$16 sps:$4 sm:$0xff]  }
  0xff   :  { %3926 = vmatprep.subr.bf16.mxu1 %v6062_v33  ;;  %v6134_v33 = vld [vmem:[#allocation2 + $0xf64] ss:$16 sps:$4 sm:$0xff]  }
 0x100   :  { %3836 = vmatmul.mubr.bf16.vlgmr.msra.gmra.mxu0 %v6997_v38 }
 0x101   :  { %3877 = vmatmul.mubr.bf16.vlgmr.msra.gmra.mxu1 %v7001_v39  ;;  %3886 = vmatpush1.bf16.msra.mxu0 %v6057_v34  ;;  %v6129_v34 = vld [vmem:[#allocation2 + $0xd60] ss:$16 sps:$4 sm:$0xff]  }
 0x102   :  { %3927 = vmatpush1.bf16.msra.mxu1 %v6060_v41  ;;  %3887 = vmatprep.subr.bf16.mxu0 %v6065_v42  ;;  %v6132_v41 = vld [vmem:[#allocation2 + $0xf60] ss:$16 sps:$4 sm:$0xff]   ;;  %v6137_v42 = vld [vmem:[#allocation2 + $0xd44] ss:$16 sps:$4 sm:$0xff]  }
 0x103   :  { %3928 = vmatprep.subr.bf16.mxu1 %v6068_v43  ;;  %3917 = vmatprep.mubr.bf16.mxu0 %v7010_v22  ;;  %v6140_v43 = vld [vmem:[#allocation2 + $0xf44] ss:$16 sps:$4 sm:$0xff]  }
 0x104   :  { %3958 = vmatprep.mubr.bf16.mxu1 %v7014_v23 }
 0x105   :  { %3888 = vmatpush1.bf16.msra.mxu0 %v6063_v44  ;;  %v6135_v44 = vld [vmem:[#allocation2 + $0xd40] ss:$16 sps:$4 sm:$0xff]  }
 0x106   :  { %3929 = vmatpush1.bf16.msra.mxu1 %v6066_v45  ;;  %3889 = vmatprep.subr.bf16.mxu0 %v6071_v46  ;;  %v6138_v45 = vld [vmem:[#allocation2 + $0xf40] ss:$16 sps:$4 sm:$0xff]   ;;  %v676_v46 = vlaneseq }
 0x107   :  { %3930 = vmatprep.subr.bf16.mxu1 %v6074_v48  ;;  %v6143_v48 = vld [vmem:[#allocation2 + $0xd24] ss:$16 sps:$4 sm:$0xff]  }
 0x109   :  { %3890 = vmatpush1.bf16.msra.mxu0 %v6069_v49  ;;  %v6146_v49 = vld [vmem:[#allocation2 + $0xf24] ss:$16 sps:$4 sm:$0xff]  }
 0x10a   :  { %3931 = vmatpush1.bf16.msra.mxu1 %v6072_v50  ;;  %3891 = vmatprep.subr.bf16.mxu0 %v6077_v52  ;;  %v6141_v50 = vld [vmem:[#allocation2 + $0xd20] ss:$16 sps:$4 sm:$0xff]  }
 0x10b   :  { %3932 = vmatprep.subr.bf16.mxu1 %v6080_v53  ;;  %v6144_v52 = vld [vmem:[#allocation2 + $0xf20] ss:$16 sps:$4 sm:$0xff]   ;;  %v7020_v53 = vshrl.u32 %v676_v46, 7  ;;  %v6189_v46 = vld [vmem:[#allocation2 + $0x1044] ss:$16 sps:$4 sm:$0xff]  }
 0x10d   :  { %3892 = vmatpush1.bf16.msra.mxu0 %v6075_v54  ;;  %v6149_v54 = vld [vmem:[#allocation2 + $0xd04] ss:$16 sps:$4 sm:$0xff]  }
 0x10e   :  { %3933 = vmatpush1.bf16.msra.mxu1 %v6078_v55  ;;  %3893 = vmatprep.subr.bf16.mxu0 %v6083_v56  ;;  %v6152_v55 = vld [vmem:[#allocation2 + $0xf04] ss:$16 sps:$4 sm:$0xff]   ;;  %v6147_v56 = vld [vmem:[#allocation2 + $0xd00] ss:$16 sps:$4 sm:$0xff]  }
 0x10f   :  { %3934 = vmatprep.subr.bf16.mxu1 %v6086_v57  ;;  %v6150_v57 = vld [vmem:[#allocation2 + $0xf00] ss:$16 sps:$4 sm:$0xff]  }
 0x111   :  { %3894 = vmatpush1.bf16.msra.mxu0 %v6081_v58  ;;  %v674_v58 = vld [vmem:[#allocation4] sm:$0xf] }
 0x112   :  { %3935 = vmatpush1.bf16.msra.mxu1 %v6084_v59  ;;  %3895 = vmatprep.subr.bf16.mxu0 %v6089_v60  ;;  %v678_v59 = vsub.s32 0, %v7020_v53  ;;  %v6159_v60 = vld [vmem:[#allocation2 + $0x10e4] ss:$16 sps:$4 sm:$0xff]  }
 0x113   :  { %3936 = vmatprep.subr.bf16.mxu1 %v6092_v61  ;;  %v6162_v61 = vld [vmem:[#allocation2 + $0xec] ss:$16 sps:$4 sm:$0xff]  }
 0x115   :  { %3896 = vmatpush1.bf16.msra.mxu0 %v6087_v62  ;;  %v682_v62 = vsub.s32 1, %v7020_v53 }
 0x116   :  { %3937 = vmatpush1.bf16.msra.mxu1 %v6090_v63  ;;  %3897 = vmatprep.subr.bf16.mxu0 %v6095_v0  ;;  %v7026_v63 = vcombine.low %v6993_v35, %v6993_v35  ;;  %v7030_v0 = vcombine.low %v7006_v40, %v7006_v40  ;;  %v6165_v35 = vld [vmem:[#allocation2 + $0x10c4] ss:$16 sps:$4 sm:$0xff]  }
 0x117   :  { %3938 = vmatprep.subr.bf16.mxu1 %v6098_v1  ;;  %v7035_v1 = vld [vmem:[%s7170_s0 + $0x40] sm:$0xff]  ;;  %v683_v40 = vrot.slane %v674_v58, %v682_v62 }
 0x119   :  { %3898 = vmatpush1.bf16.msra.mxu0 %v6093_v2  ;;  %v679_v2 = vrot.slane %v674_v58, %v678_v59  ;;  %v6204_v58 = vld [vmem:[#allocation2 + $0xc] ss:$16 sps:$4 sm:$0xff]  }
 0x11a   :  { %3939 = vmatpush1.bf16.msra.mxu1 %v6096_v3  ;;  %3899 = vmatprep.subr.bf16.mxu0 %v6101_v4  ;;  %v6157_v3 = vld [vmem:[#allocation2 + $0x10e0] ss:$16 sps:$4 sm:$0xff]   ;;  %v6160_v4 = vld [vmem:[#allocation2 + $0xe8] ss:$16 sps:$4 sm:$0xff]  }
 0x11b   :  { %3940 = vmatprep.subr.bf16.mxu1 %v6104_v5  ;;  %v6168_v5 = vld [vmem:[#allocation2 + $0xcc] ss:$16 sps:$4 sm:$0xff]  }
 0x11d   :  { %3900 = vmatpush1.bf16.msra.mxu0 %v6099_v8  ;;  %v7043_v8 = vcombine.high %v7035_v1, %v7035_v1 }
 0x11e   :  { %3941 = vmatpush1.bf16.msra.mxu1 %v6102_v9  ;;  %3901 = vmatprep.subr.bf16.mxu0 %v6107_v10 }
 0x11f   :  { %3942 = vmatprep.subr.bf16.mxu1 %v6110_v11 }
 0x121   :  { %3902 = vmatpush2.bf16.msra.mxu0 %v6105_v12  ;;  %v6163_v12 = vld [vmem:[#allocation2 + $0x10c0] ss:$16 sps:$4 sm:$0xff]  }
 0x122   :  { %3943 = vmatpush2.bf16.msra.mxu1 %v6108_v13  ;;  %3903 = vmatprep.subr.bf16.mxu0 %v6113_v14  ;;  %v6166_v13 = vld [vmem:[#allocation2 + $0xc8] ss:$16 sps:$4 sm:$0xff]  }
 0x123   :  { %3944 = vmatprep.subr.bf16.mxu1 %v6116_v15 }
 0x125   :  { %3904 = vmatpush2.bf16.msra.mxu0 %v6111_v18  ;;  %v6171_v18 = vld [vmem:[#allocation2 + $0x10a4] ss:$16 sps:$4 sm:$0xff]  }
 0x126   :  { %3945 = vmatpush2.bf16.msra.mxu1 %v6114_v19  ;;  %3905 = vmatprep.subr.bf16.mxu0 %v6119_v20  ;;  %v6174_v19 = vld [vmem:[#allocation2 + $0xac] ss:$16 sps:$4 sm:$0xff]  }
 0x127   :  { %3946 = vmatprep.subr.bf16.mxu1 %v6122_v21 }
 0x129   :  { %3906 = vmatpush2.bf16.msra.mxu0 %v6117_v26 }
 0x12a   :  { %3947 = vmatpush2.bf16.msra.mxu1 %v6120_v27  ;;  %3907 = vmatprep.subr.bf16.mxu0 %v6125_v28 }
 0x12b   :  { %3948 = vmatprep.subr.bf16.mxu1 %v6128_v29  ;;  %v6169_v29 = vld [vmem:[#allocation2 + $0x10a0] ss:$16 sps:$4 sm:$0xff]  }
 0x12d   :  { %3908 = vmatpush2.bf16.msra.mxu0 %v6123_v30  ;;  %v6172_v30 = vld [vmem:[#allocation2 + $0xa8] ss:$16 sps:$4 sm:$0xff]  }
 0x12e   :  { %3949 = vmatpush2.bf16.msra.mxu1 %v6126_v31  ;;  %3909 = vmatprep.subr.bf16.mxu0 %v6131_v32 }
 0x12f   :  { %3950 = vmatprep.subr.bf16.mxu1 %v6134_v33  ;;  %v6177_v33 = vld [vmem:[#allocation2 + $0x1084] ss:$16 sps:$4 sm:$0xff]  }
 0x131   :  { %3910 = vmatpush2.bf16.msra.mxu0 %v6129_v34  ;;  %v6180_v34 = vld [vmem:[#allocation2 + $0x8c] ss:$16 sps:$4 sm:$0xff]  }
 0x132   :  { %3951 = vmatpush2.bf16.msra.mxu1 %v6132_v41  ;;  %3911 = vmatprep.subr.bf16.mxu0 %v6137_v42  ;;  %v6175_v41 = vld [vmem:[#allocation2 + $0x1080] ss:$16 sps:$4 sm:$0xff]   ;;  %v6178_v42 = vld [vmem:[#allocation2 + $0x88] ss:$16 sps:$4 sm:$0xff]  }
 0x133   :  { %3952 = vmatprep.subr.bf16.mxu1 %v6140_v43  ;;  %v6186_v43 = vld [vmem:[#allocation2 + $0x6c] ss:$16 sps:$4 sm:$0xff]  }
 0x135   :  { %3912 = vmatpush2.bf16.msra.mxu0 %v6135_v44  ;;  %v6181_v44 = vld [vmem:[#allocation2 + $0x1060] ss:$16 sps:$4 sm:$0xff]  }
 0x136   :  { %3953 = vmatpush2.bf16.msra.mxu1 %v6138_v45  ;;  %3913 = vmatprep.subr.bf16.mxu0 %v6143_v48  ;;  %v6184_v45 = vld [vmem:[#allocation2 + $0x68] ss:$16 sps:$4 sm:$0xff]   ;;  %v6192_v48 = vld [vmem:[#allocation2 + $0x4c] ss:$16 sps:$4 sm:$0xff]  }
 0x137   :  { %3954 = vmatprep.subr.bf16.mxu1 %v6146_v49  ;;  %v6187_v49 = vld [vmem:[#allocation2 + $0x1040] ss:$16 sps:$4 sm:$0xff]  }
 0x139   :  { %3914 = vmatpush2.bf16.msra.mxu0 %v6141_v50  ;;  %v6190_v50 = vld [vmem:[#allocation2 + $0x48] ss:$16 sps:$4 sm:$0xff]  }
 0x13a   :  { %3955 = vmatpush2.bf16.msra.mxu1 %v6144_v52  ;;  %3915 = vmatprep.subr.bf16.mxu0 %v6149_v54  ;;  %v6195_v52 = vld [vmem:[#allocation2 + $0x1024] ss:$16 sps:$4 sm:$0xff]   ;;  %v6198_v54 = vld [vmem:[#allocation2 + $0x2c] ss:$16 sps:$4 sm:$0xff]  }
 0x13b   :  { %3956 = vmatprep.subr.bf16.mxu1 %v6152_v55  ;;  %v6193_v55 = vld [vmem:[#allocation2 + $0x1020] ss:$16 sps:$4 sm:$0xff]  }
 0x13d   :  { %3916 = vmatpush2.bf16.msra.mxu0 %v6147_v56  ;;  %v6196_v56 = vld [vmem:[#allocation2 + $0x28] ss:$16 sps:$4 sm:$0xff]  }
 0x13e   :  { %3957 = vmatpush2.bf16.msra.mxu1 %v6150_v57  ;;  %3967 = vmatprep.subr.bf16.mxu0 %v6159_v60  ;;  %v6201_v57 = vld [vmem:[#allocation2 + $0x1004] ss:$16 sps:$4 sm:$0xff]   ;;  %v6199_v60 = vld [vmem:[#allocation2 + $0x1000] ss:$16 sps:$4 sm:$0xff]  }
 0x13f   :  { %4008 = vmatprep.subr.bf16.mxu1 %v6162_v61  ;;  %v6202_v61 = vld [vmem:[#allocation2 + $0x8] ss:$16 sps:$4 sm:$0xff]  }
 0x140   :  { %v3673_v9 = vpop.f32.mrf.mxu0  ;;  %3918 = vmatmul.mubr.bf16.vlgmr.msra.gmra.mxu0 %v7026_v63 }
 0x141   :  { %v3714_v10 = vpop.f32.mrf.mxu1  ;;  %3959 = vmatmul.mubr.bf16.vlgmr.msra.gmra.mxu1 %v7030_v0  ;;  %v3674_v11 = vadd.f32 %v3673_v9, %v679_v2  ;;  %3968 = vmatpush1.bf16.msra.mxu0 %v6157_v3  ;;  %v6207_v2 = vld [vmem:[#allocation2 + $0x11e4] ss:$16 sps:$4 sm:$0xff]   ;;  %v6210_v3 = vld [vmem:[#allocation2 + $0x1ec] ss:$16 sps:$4 sm:$0xff]   ;;  %v6211_v9 = vld [vmem:[#allocation2 + $0x11c0] ss:$16 sps:$4 sm:$0xff]  }
 0x142   :  { %4009 = vmatpush1.bf16.msra.mxu1 %v6160_v4  ;;  %v3675_v14 = vpop.f32.mrf.mxu0  ;;  %3969 = vmatprep.subr.bf16.mxu0 %v6165_v35  ;;  %v6205_v4 = vld [vmem:[#allocation2 + $0x11e0] ss:$16 sps:$4 sm:$0xff]   ;;  %v6208_v35 = vld [vmem:[#allocation2 + $0x1e8] ss:$16 sps:$4 sm:$0xff]  }
 0x143   :  { %v3716_v15 = vpop.f32.mrf.mxu1  ;;  %4010 = vmatprep.subr.bf16.mxu1 %v6168_v5  ;;  %v7047_v20 = vadd.f32 %v3714_v10, %v3674_v11  ;;  %v3676_v21 = vadd.f32 %v3675_v14, %v683_v40  ;;  %3999 = vmatprep.mubr.bf16.mxu0 %v7043_v8  ;;  %v6213_v5 = vld [vmem:[#allocation2 + $0x11c4] ss:$16 sps:$4 sm:$0xff]   ;;  %v6216_v40 = vld [vmem:[#allocation2 + $0x1cc] ss:$16 sps:$4 sm:$0xff]   ;;  %v6214_v10 = vld [vmem:[#allocation2 + $0x1c8] ss:$16 sps:$4 sm:$0xff]  }
 0x144   :  { %4040 = vmatprep.mubr.bf16.mxu1 %v6925_v47  ;;  %v3677_v26 = vpop.f32.mrf.mxu0  ;;  %v6183_v47 = vld [vmem:[#allocation2 + $0x1064] ss:$16 sps:$4 sm:$0xff]   ;;  %v6220_v14 = vld [vmem:[#allocation2 + $0x1a8] ss:$16 sps:$4 sm:$0xff]  }
 0x145   :  { %v3718_v27 = vpop.f32.mrf.mxu1  ;;  %v7051_v28 = vadd.f32 %v3716_v15, %v3676_v21  ;;  %3970 = vmatpush1.bf16.msra.mxu0 %v6163_v12  ;;  %v6219_v11 = vld [vmem:[#allocation2 + $0x11a4] ss:$16 sps:$4 sm:$0xff]   ;;  %v6222_v12 = vld [vmem:[#allocation2 + $0x1ac] ss:$16 sps:$4 sm:$0xff]   ;;  %v6226_v21 = vld [vmem:[#allocation2 + $0x188] ss:$16 sps:$4 sm:$0xff]  }
 0x146   :  { %4011 = vmatpush1.bf16.msra.mxu1 %v6166_v13  ;;  %v3678_v31 = vpop.f32.mrf.mxu0  ;;  %3971 = vmatprep.subr.bf16.mxu0 %v6171_v18  ;;  %v6217_v13 = vld [vmem:[#allocation2 + $0x11a0] ss:$16 sps:$4 sm:$0xff]   ;;  %v6225_v15 = vld [vmem:[#allocation2 + $0x1184] ss:$16 sps:$4 sm:$0xff]   ;;  %v6228_v18 = vld [vmem:[#allocation2 + $0x18c] ss:$16 sps:$4 sm:$0xff]  }
 0x147   :  { %v3719_v32 = vpop.f32.mrf.mxu1  ;;  %4012 = vmatprep.subr.bf16.mxu1 %v6174_v19  ;;  %v6223_v19 = vld [vmem:[#allocation2 + $0x1180] ss:$16 sps:$4 sm:$0xff]   ;;  %v6231_v26 = vld [vmem:[#allocation2 + $0x1164] ss:$16 sps:$4 sm:$0xff]   ;;  %v6234_v27 = vld [vmem:[#allocation2 + $0x16c] ss:$16 sps:$4 sm:$0xff]  }
 0x148   :  { %v6237_v31 = vld [vmem:[#allocation2 + $0x1144] ss:$16 sps:$4 sm:$0xff]   ;;  %v6240_v32 = vld [vmem:[#allocation2 + $0x14c] ss:$16 sps:$4 sm:$0xff]  }
 0x149   :  { %3972 = vmatpush1.bf16.msra.mxu0 %v6169_v29  ;;  %v6229_v29 = vld [vmem:[#allocation2 + $0x1160] ss:$16 sps:$4 sm:$0xff]  }
 0x14a   :  { %4013 = vmatpush1.bf16.msra.mxu1 %v6172_v30  ;;  %3973 = vmatprep.subr.bf16.mxu0 %v6177_v33  ;;  %v6232_v30 = vld [vmem:[#allocation2 + $0x168] ss:$16 sps:$4 sm:$0xff]   ;;  %v6235_v33 = vld [vmem:[#allocation2 + $0x1140] ss:$16 sps:$4 sm:$0xff]  }
 0x14b   :  { %4014 = vmatprep.subr.bf16.mxu1 %v6180_v34  ;;  %v6238_v34 = vld [vmem:[#allocation2 + $0x148] ss:$16 sps:$4 sm:$0xff]  }
 0x14d   :  { %3974 = vmatpush1.bf16.msra.mxu0 %v6175_v41  ;;  %v6243_v41 = vld [vmem:[#allocation2 + $0x1124] ss:$16 sps:$4 sm:$0xff]  }
 0x14e   :  { %4015 = vmatpush1.bf16.msra.mxu1 %v6178_v42  ;;  %3975 = vmatprep.subr.bf16.mxu0 %v6183_v47  ;;  %v6246_v42 = vld [vmem:[#allocation2 + $0x12c] ss:$16 sps:$4 sm:$0xff]   ;;  %v6241_v47 = vld [vmem:[#allocation2 + $0x1120] ss:$16 sps:$4 sm:$0xff]  }
 0x14f   :  { %4016 = vmatprep.subr.bf16.mxu1 %v6186_v43  ;;  %v6244_v43 = vld [vmem:[#allocation2 + $0x128] ss:$16 sps:$4 sm:$0xff]  }
 0x151   :  { %3976 = vmatpush1.bf16.msra.mxu0 %v6181_v44  ;;  %v6249_v44 = vld [vmem:[#allocation2 + $0x1104] ss:$16 sps:$4 sm:$0xff]  }
 0x152   :  { %4017 = vmatpush1.bf16.msra.mxu1 %v6184_v45  ;;  %3977 = vmatprep.subr.bf16.mxu0 %v6189_v46  ;;  %v6252_v45 = vld [vmem:[#allocation2 + $0x10c] ss:$16 sps:$4 sm:$0xff]   ;;  %v6247_v46 = vld [vmem:[#allocation2 + $0x1100] ss:$16 sps:$4 sm:$0xff]  }
 0x153   :  { %4018 = vmatprep.subr.bf16.mxu1 %v6192_v48  ;;  %v6250_v48 = vld [vmem:[#allocation2 + $0x108] ss:$16 sps:$4 sm:$0xff]  }
 0x155   :  { %3978 = vmatpush1.bf16.msra.mxu0 %v6187_v49  ;;  %v6257_v49 = vld [vmem:[#allocation2 + $0x2ec] ss:$16 sps:$4 sm:$0xff]  }
 0x156   :  { %4019 = vmatpush1.bf16.msra.mxu1 %v6190_v50  ;;  %3979 = vmatprep.subr.bf16.mxu0 %v6195_v52  ;;  %v6260_v50 = vld [vmem:[#allocation2 + $0x4ec] ss:$16 sps:$4 sm:$0xff]   ;;  %v6255_v52 = vld [vmem:[#allocation2 + $0x2e8] ss:$16 sps:$4 sm:$0xff]  }
 0x157   :  { %4020 = vmatprep.subr.bf16.mxu1 %v6198_v54  ;;  %v6258_v54 = vld [vmem:[#allocation2 + $0x4e8] ss:$16 sps:$4 sm:$0xff]  }
 0x159   :  { %3980 = vmatpush1.bf16.msra.mxu0 %v6193_v55  ;;  %v7055_v55 = vcombine.low %v7035_v1, %v7035_v1 }
 0x15a   :  { %4021 = vmatpush1.bf16.msra.mxu1 %v6196_v56  ;;  %3981 = vmatprep.subr.bf16.mxu0 %v6201_v57  ;;  %v6263_v56 = vld [vmem:[#allocation2 + $0x2cc] ss:$16 sps:$4 sm:$0xff]  }
 0x15b   :  { %4022 = vmatprep.subr.bf16.mxu1 %v6204_v58  ;;  %v6266_v57 = vld [vmem:[#allocation2 + $0x4cc] ss:$16 sps:$4 sm:$0xff]   ;;  %v6261_v58 = vld [vmem:[#allocation2 + $0x2c8] ss:$16 sps:$4 sm:$0xff]  }
 0x15d   :  { %3982 = vmatpush1.bf16.msra.mxu0 %v6199_v60  ;;  %v6264_v60 = vld [vmem:[#allocation2 + $0x4c8] ss:$16 sps:$4 sm:$0xff]  }
 0x15e   :  { %4023 = vmatpush1.bf16.msra.mxu1 %v6202_v61  ;;  %3983 = vmatprep.subr.bf16.mxu0 %v6207_v2 }
 0x15f   :  { %4024 = vmatprep.subr.bf16.mxu1 %v6210_v3 }
 0x161   :  { %3984 = vmatpush2.bf16.msra.mxu0 %v6205_v4 }
 0x162   :  { %4025 = vmatpush2.bf16.msra.mxu1 %v6208_v35  ;;  %3985 = vmatprep.subr.bf16.mxu0 %v6213_v5  ;;  %v6269_v35 = vld [vmem:[#allocation2 + $0x2ac] ss:$16 sps:$4 sm:$0xff]  }
 0x163   :  { %4026 = vmatprep.subr.bf16.mxu1 %v6216_v40  ;;  %v6272_v5 = vld [vmem:[#allocation2 + $0x4ac] ss:$16 sps:$4 sm:$0xff]  }
 0x165   :  { %3986 = vmatpush2.bf16.msra.mxu0 %v6211_v9 }
 0x166   :  { %4027 = vmatpush2.bf16.msra.mxu1 %v6214_v10  ;;  %3987 = vmatprep.subr.bf16.mxu0 %v6219_v11  ;;  %v6267_v10 = vld [vmem:[#allocation2 + $0x2a8] ss:$16 sps:$4 sm:$0xff]  }
 0x167   :  { %4028 = vmatprep.subr.bf16.mxu1 %v6222_v12  ;;  %v6270_v11 = vld [vmem:[#allocation2 + $0x4a8] ss:$16 sps:$4 sm:$0xff]  }
 0x169   :  { %3988 = vmatpush2.bf16.msra.mxu0 %v6217_v13 }
 0x16a   :  { %4029 = vmatpush2.bf16.msra.mxu1 %v6220_v14  ;;  %3989 = vmatprep.subr.bf16.mxu0 %v6225_v15  ;;  %v6275_v15 = vld [vmem:[#allocation2 + $0x28c] ss:$16 sps:$4 sm:$0xff]  }
 0x16b   :  { %4030 = vmatprep.subr.bf16.mxu1 %v6228_v18  ;;  %v6278_v18 = vld [vmem:[#allocation2 + $0x48c] ss:$16 sps:$4 sm:$0xff]  }
 0x16d   :  { %3990 = vmatpush2.bf16.msra.mxu0 %v6223_v19  ;;  %v6276_v19 = vld [vmem:[#allocation2 + $0x488] ss:$16 sps:$4 sm:$0xff]  }
 0x16e   :  { %4031 = vmatpush2.bf16.msra.mxu1 %v6226_v21  ;;  %3991 = vmatprep.subr.bf16.mxu0 %v6231_v26  ;;  %v6279_v21 = vld [vmem:[#allocation2 + $0x268] ss:$16 sps:$4 sm:$0xff]  }
 0x16f   :  { %4032 = vmatprep.subr.bf16.mxu1 %v6234_v27  ;;  %v6282_v26 = vld [vmem:[#allocation2 + $0x468] ss:$16 sps:$4 sm:$0xff]   ;;  %v6287_v27 = vld [vmem:[#allocation2 + $0x24c] ss:$16 sps:$4 sm:$0xff]  }
 0x171   :  { %3992 = vmatpush2.bf16.msra.mxu0 %v6229_v29  ;;  %v6290_v29 = vld [vmem:[#allocation2 + $0x44c] ss:$16 sps:$4 sm:$0xff]  }
 0x172   :  { %4033 = vmatpush2.bf16.msra.mxu1 %v6232_v30  ;;  %3993 = vmatprep.subr.bf16.mxu0 %v6237_v31  ;;  %v6285_v30 = vld [vmem:[#allocation2 + $0x248] ss:$16 sps:$4 sm:$0xff]  }
 0x173   :  { %4034 = vmatprep.subr.bf16.mxu1 %v6240_v32  ;;  %v6288_v31 = vld [vmem:[#allocation2 + $0x448] ss:$16 sps:$4 sm:$0xff]   ;;  %v6293_v32 = vld [vmem:[#allocation2 + $0x22c] ss:$16 sps:$4 sm:$0xff]  }
 0x175   :  { %3994 = vmatpush2.bf16.msra.mxu0 %v6235_v33  ;;  %v6296_v33 = vld [vmem:[#allocation2 + $0x42c] ss:$16 sps:$4 sm:$0xff]  }
 0x176   :  { %4035 = vmatpush2.bf16.msra.mxu1 %v6238_v34  ;;  %3995 = vmatprep.subr.bf16.mxu0 %v6243_v41  ;;  %v6291_v34 = vld [vmem:[#allocation2 + $0x228] ss:$16 sps:$4 sm:$0xff]  }
 0x177   :  { %4036 = vmatprep.subr.bf16.mxu1 %v6246_v42  ;;  %v6294_v41 = vld [vmem:[#allocation2 + $0x428] ss:$16 sps:$4 sm:$0xff]   ;;  %v6299_v42 = vld [vmem:[#allocation2 + $0x20c] ss:$16 sps:$4 sm:$0xff]  }
 0x179   :  { %3996 = vmatpush2.bf16.msra.mxu0 %v6241_v47  ;;  %v6302_v47 = vld [vmem:[#allocation2 + $0x40c] ss:$16 sps:$4 sm:$0xff]  }
 0x17a   :  { %4037 = vmatpush2.bf16.msra.mxu1 %v6244_v43  ;;  %3997 = vmatprep.subr.bf16.mxu0 %v6249_v44  ;;  %v6297_v43 = vld [vmem:[#allocation2 + $0x208] ss:$16 sps:$4 sm:$0xff]  }
 0x17b   :  { %4038 = vmatprep.subr.bf16.mxu1 %v6252_v45  ;;  %v6300_v44 = vld [vmem:[#allocation2 + $0x408] ss:$16 sps:$4 sm:$0xff]   ;;  %v6305_v45 = vld [vmem:[#allocation2 + $0x3ec] ss:$16 sps:$4 sm:$0xff]  }
 0x17d   :  { %3998 = vmatpush2.bf16.msra.mxu0 %v6247_v46  ;;  %v6308_v46 = vld [vmem:[#allocation2 + $0x5ec] ss:$16 sps:$4 sm:$0xff]  }
 0x17e   :  { %4039 = vmatpush2.bf16.msra.mxu1 %v6250_v48  ;;  %4049 = vmatprep.subr.bf16.mxu0 %v6257_v49  ;;  %v6303_v48 = vld [vmem:[#allocation2 + $0x3e8] ss:$16 sps:$4 sm:$0xff]  }
 0x17f   :  { %4090 = vmatprep.subr.bf16.mxu1 %v6260_v50  ;;  %v6306_v49 = vld [vmem:[#allocation2 + $0x5e8] ss:$16 sps:$4 sm:$0xff]   ;;  %v6311_v50 = vld [vmem:[#allocation2 + $0x3cc] ss:$16 sps:$4 sm:$0xff]  }
 0x180   :  { %v3755_v61 = vpop.f32.mrf.mxu0  ;;  %4000 = vmatmul.mubr.bf16.vlgmr.msra.gmra.mxu0 %v7055_v55 }
 0x181   :  { %v3796_v2 = vpop.f32.mrf.mxu1  ;;  %4041 = vmatmul.mubr.bf16.vlgmr.msra.gmra.mxu1 %v6934_v6  ;;  %v3756_v3 = vadd.f32 %v3755_v61, %v7047_v20  ;;  %4050 = vmatpush1.bf16.msra.mxu0 %v6255_v52  ;;  %v6314_v52 = vld [vmem:[#allocation2 + $0x5cc] ss:$16 sps:$4 sm:$0xff]   ;;  %v6318_v61 = vld [vmem:[#allocation2 + $0x5a8] ss:$16 sps:$4 sm:$0xff]  }
 0x182   :  { %4091 = vmatpush1.bf16.msra.mxu1 %v6258_v54  ;;  %v3757_v1 = vpop.f32.mrf.mxu0  ;;  %4051 = vmatprep.subr.bf16.mxu0 %v6263_v56  ;;  %v6309_v54 = vld [vmem:[#allocation2 + $0x3c8] ss:$16 sps:$4 sm:$0xff]  }
 0x183   :  { %v3798_v4 = vpop.f32.mrf.mxu1  ;;  %4092 = vmatprep.subr.bf16.mxu1 %v6266_v57  ;;  %v7060_v40 = vadd.f32 %v3796_v2, %v3756_v3  ;;  %v3758_v9 = vadd.f32 %v3757_v1, %v7051_v28  ;;  %4081 = vmatprep.mubr.bf16.mxu0 %v6930_v51  ;;  %v6273_v28 = vld [vmem:[#allocation2 + $0x288] ss:$16 sps:$4 sm:$0xff]   ;;  %v6281_v51 = vld [vmem:[#allocation2 + $0x26c] ss:$16 sps:$4 sm:$0xff]  }
 0x184   :  { %4122 = vmatprep.mubr.bf16.mxu1 %v6952_v36  ;;  %v3759_v6 = vpop.f32.mrf.mxu0  ;;  %v6284_v36 = vld [vmem:[#allocation2 + $0x46c] ss:$16 sps:$4 sm:$0xff]   ;;  %v6312_v56 = vld [vmem:[#allocation2 + $0x5c8] ss:$16 sps:$4 sm:$0xff]  }
 0x185   :  { %v3800_v20 = vpop.f32.mrf.mxu1  ;;  %v7065_v12 = vadd.f32 %v3798_v4, %v3758_v9  ;;  %4052 = vmatpush1.bf16.msra.mxu0 %v6261_v58  ;;  %v6317_v57 = vld [vmem:[#allocation2 + $0x3ac] ss:$16 sps:$4 sm:$0xff]   ;;  %v6321_v1 = vld [vmem:[#allocation2 + $0x388] ss:$16 sps:$4 sm:$0xff]  }
 0x186   :  { %4093 = vmatpush1.bf16.msra.mxu1 %v6264_v60  ;;  %v3760_v13 = vpop.f32.mrf.mxu0  ;;  %4053 = vmatprep.subr.bf16.mxu0 %v6269_v35  ;;  %v6320_v58 = vld [vmem:[#allocation2 + $0x5ac] ss:$16 sps:$4 sm:$0xff]   ;;  %v6315_v60 = vld [vmem:[#allocation2 + $0x3a8] ss:$16 sps:$4 sm:$0xff]  }
 0x187   :  { %v3801_v14 = vpop.f32.mrf.mxu1  ;;  %4094 = vmatprep.subr.bf16.mxu1 %v6272_v5  ;;  %v6323_v2 = vld [vmem:[#allocation2 + $0x38c] ss:$16 sps:$4 sm:$0xff]   ;;  %v6324_v4 = vld [vmem:[#allocation2 + $0x588] ss:$16 sps:$4 sm:$0xff]  }
 0x188   :  { %v6326_v3 = vld [vmem:[#allocation2 + $0x58c] ss:$16 sps:$4 sm:$0xff]   ;;  %v6327_v9 = vld [vmem:[#allocation2 + $0x368] ss:$16 sps:$4 sm:$0xff]  }
 0x189   :  { %4054 = vmatpush1.bf16.msra.mxu0 %v6267_v10  ;;  %v6329_v35 = vld [vmem:[#allocation2 + $0x36c] ss:$16 sps:$4 sm:$0xff]   ;;  %v6330_v10 = vld [vmem:[#allocation2 + $0x568] ss:$16 sps:$4 sm:$0xff]  }
 0x18a   :  { %4095 = vmatpush1.bf16.msra.mxu1 %v6270_v11  ;;  %4055 = vmatprep.subr.bf16.mxu0 %v6275_v15  ;;  %v6332_v5 = vld [vmem:[#allocation2 + $0x56c] ss:$16 sps:$4 sm:$0xff]   ;;  %v6333_v20 = vld [vmem:[#allocation2 + $0x348] ss:$16 sps:$4 sm:$0xff]  }
 0x18b   :  { %4096 = vmatprep.subr.bf16.mxu1 %v6278_v18  ;;  %v6335_v11 = vld [vmem:[#allocation2 + $0x34c] ss:$16 sps:$4 sm:$0xff]   ;;  %v6336_v13 = vld [vmem:[#allocation2 + $0x548] ss:$16 sps:$4 sm:$0xff]  }
 0x18c   :  { %v6338_v6 = vld [vmem:[#allocation2 + $0x54c] ss:$16 sps:$4 sm:$0xff]   ;;  %v6339_v18 = vld [vmem:[#allocation2 + $0x328] ss:$16 sps:$4 sm:$0xff]  }
 0x18d   :  { %4056 = vmatpush1.bf16.msra.mxu0 %v6273_v28  ;;  %v6341_v14 = vld [vmem:[#allocation2 + $0x32c] ss:$16 sps:$4 sm:$0xff]   ;;  %v6342_v28 = vld [vmem:[#allocation2 + $0x528] ss:$16 sps:$4 sm:$0xff]  }
 0x18e   :  { %4097 = vmatpush1.bf16.msra.mxu1 %v6276_v19  ;;  %4057 = vmatprep.subr.bf16.mxu0 %v6281_v51  ;;  %v6344_v15 = vld [vmem:[#allocation2 + $0x52c] ss:$16 sps:$4 sm:$0xff]  }
 0x18f   :  { %4098 = vmatprep.subr.bf16.mxu1 %v6284_v36  ;;  %v6347_v19 = vld [vmem:[#allocation2 + $0x30c] ss:$16 sps:$4 sm:$0xff]   ;;  %v6345_v36 = vld [vmem:[#allocation2 + $0x308] ss:$16 sps:$4 sm:$0xff]  }
 0x190   :  { %v6350_v51 = vld [vmem:[#allocation2 + $0x50c] ss:$16 sps:$4 sm:$0xff]  }
 0x191   :  { %4058 = vmatpush1.bf16.msra.mxu0 %v6279_v21  ;;  %v6348_v21 = vld [vmem:[#allocation2 + $0x508] ss:$16 sps:$4 sm:$0xff]  }
 0x192   :  { %4099 = vmatpush1.bf16.msra.mxu1 %v6282_v26  ;;  %4059 = vmatprep.subr.bf16.mxu0 %v6287_v27  ;;  %v6353_v26 = vld [vmem:[#allocation2 + $0x6ec] ss:$16 sps:$4 sm:$0xff]  }
 0x193   :  { %4100 = vmatprep.subr.bf16.mxu1 %v6290_v29  ;;  %v6356_v27 = vld [vmem:[#allocation2 + $0x8ec] ss:$16 sps:$4 sm:$0xff]   ;;  %v6351_v29 = vld [vmem:[#allocation2 + $0x6e8] ss:$16 sps:$4 sm:$0xff]  }
 0x195   :  { %4060 = vmatpush1.bf16.msra.mxu0 %v6285_v30  ;;  %v6354_v30 = vld [vmem:[#allocation2 + $0x8e8] ss:$16 sps:$4 sm:$0xff]  }
 0x196   :  { %4101 = vmatpush1.bf16.msra.mxu1 %v6288_v31  ;;  %4061 = vmatprep.subr.bf16.mxu0 %v6293_v32  ;;  %v6359_v31 = vld [vmem:[#allocation2 + $0x6cc] ss:$16 sps:$4 sm:$0xff]  }
 0x197   :  { %4102 = vmatprep.subr.bf16.mxu1 %v6296_v33  ;;  %v6362_v32 = vld [vmem:[#allocation2 + $0x8cc] ss:$16 sps:$4 sm:$0xff]   ;;  %v6357_v33 = vld [vmem:[#allocation2 + $0x6c8] ss:$16 sps:$4 sm:$0xff]  }
 0x199   :  { %4062 = vmatpush1.bf16.msra.mxu0 %v6291_v34  ;;  %v6360_v34 = vld [vmem:[#allocation2 + $0x8c8] ss:$16 sps:$4 sm:$0xff]  }
 0x19a   :  { %4103 = vmatpush1.bf16.msra.mxu1 %v6294_v41  ;;  %4063 = vmatprep.subr.bf16.mxu0 %v6299_v42 }
 0x19b   :  { %4104 = vmatprep.subr.bf16.mxu1 %v6302_v47 }
 0x19d   :  { %4064 = vmatpush1.bf16.msra.mxu0 %v6297_v43 }
 0x19e   :  { %4105 = vmatpush1.bf16.msra.mxu1 %v6300_v44  ;;  %4065 = vmatprep.subr.bf16.mxu0 %v6305_v45  ;;  %v6365_v45 = vld [vmem:[#allocation2 + $0x6ac] ss:$16 sps:$4 sm:$0xff]  }
 0x19f   :  { %4106 = vmatprep.subr.bf16.mxu1 %v6308_v46  ;;  %v6368_v46 = vld [vmem:[#allocation2 + $0x8ac] ss:$16 sps:$4 sm:$0xff]  }
 0x1a1   :  { %4066 = vmatpush2.bf16.msra.mxu0 %v6303_v48 }
 0x1a2   :  { %4107 = vmatpush2.bf16.msra.mxu1 %v6306_v49  ;;  %4067 = vmatprep.subr.bf16.mxu0 %v6311_v50  ;;  %v6363_v50 = vld [vmem:[#allocation2 + $0x6a8] ss:$16 sps:$4 sm:$0xff]  }
 0x1a3   :  { %4108 = vmatprep.subr.bf16.mxu1 %v6314_v52  ;;  %v6366_v52 = vld [vmem:[#allocation2 + $0x8a8] ss:$16 sps:$4 sm:$0xff]  }
 0x1a5   :  { %4068 = vmatpush2.bf16.msra.mxu0 %v6309_v54 }
 0x1a6   :  { %4109 = vmatpush2.bf16.msra.mxu1 %v6312_v56  ;;  %4069 = vmatprep.subr.bf16.mxu0 %v6317_v57  ;;  %v6371_v57 = vld [vmem:[#allocation2 + $0x68c] ss:$16 sps:$4 sm:$0xff]  }
 0x1a7   :  { %4110 = vmatprep.subr.bf16.mxu1 %v6320_v58  ;;  %v6374_v58 = vld [vmem:[#allocation2 + $0x88c] ss:$16 sps:$4 sm:$0xff]  }
 0x1a9   :  { %4070 = vmatpush2.bf16.msra.mxu0 %v6315_v60  ;;  %v6372_v60 = vld [vmem:[#allocation2 + $0x888] ss:$16 sps:$4 sm:$0xff]  }
 0x1aa   :  { %4111 = vmatpush2.bf16.msra.mxu1 %v6318_v61  ;;  %4071 = vmatprep.subr.bf16.mxu0 %v6323_v2  ;;  %v6375_v61 = vld [vmem:[#allocation2 + $0x668] ss:$16 sps:$4 sm:$0xff]  }
 0x1ab   :  { %4112 = vmatprep.subr.bf16.mxu1 %v6326_v3  ;;  %v6378_v2 = vld [vmem:[#allocation2 + $0x868] ss:$16 sps:$4 sm:$0xff]   ;;  %v6383_v3 = vld [vmem:[#allocation2 + $0x64c] ss:$16 sps:$4 sm:$0xff]  }
 0x1ad   :  { %4072 = vmatpush2.bf16.msra.mxu0 %v6321_v1  ;;  %v6386_v1 = vld [vmem:[#allocation2 + $0x84c] ss:$16 sps:$4 sm:$0xff]  }
 0x1ae   :  { %4113 = vmatpush2.bf16.msra.mxu1 %v6324_v4  ;;  %4073 = vmatprep.subr.bf16.mxu0 %v6329_v35  ;;  %v6381_v4 = vld [vmem:[#allocation2 + $0x648] ss:$16 sps:$4 sm:$0xff]  }
 0x1af   :  { %4114 = vmatprep.subr.bf16.mxu1 %v6332_v5  ;;  %v6384_v35 = vld [vmem:[#allocation2 + $0x848] ss:$16 sps:$4 sm:$0xff]   ;;  %v6389_v5 = vld [vmem:[#allocation2 + $0x62c] ss:$16 sps:$4 sm:$0xff]  }
 0x1b1   :  { %4074 = vmatpush2.bf16.msra.mxu0 %v6327_v9  ;;  %v6392_v9 = vld [vmem:[#allocation2 + $0x82c] ss:$16 sps:$4 sm:$0xff]  }
 0x1b2   :  { %4115 = vmatpush2.bf16.msra.mxu1 %v6330_v10  ;;  %4075 = vmatprep.subr.bf16.mxu0 %v6335_v11  ;;  %v6387_v10 = vld [vmem:[#allocation2 + $0x628] ss:$16 sps:$4 sm:$0xff]  }
 0x1b3   :  { %4116 = vmatprep.subr.bf16.mxu1 %v6338_v6  ;;  %v6390_v11 = vld [vmem:[#allocation2 + $0x828] ss:$16 sps:$4 sm:$0xff]   ;;  %v6395_v6 = vld [vmem:[#allocation2 + $0x60c] ss:$16 sps:$4 sm:$0xff]  }
 0x1b5   :  { %4076 = vmatpush2.bf16.msra.mxu0 %v6333_v20  ;;  %v6398_v20 = vld [vmem:[#allocation2 + $0x80c] ss:$16 sps:$4 sm:$0xff]  }
 0x1b6   :  { %4117 = vmatpush2.bf16.msra.mxu1 %v6336_v13  ;;  %4077 = vmatprep.subr.bf16.mxu0 %v6341_v14  ;;  %v6393_v13 = vld [vmem:[#allocation2 + $0x608] ss:$16 sps:$4 sm:$0xff]  }
 0x1b7   :  { %4118 = vmatprep.subr.bf16.mxu1 %v6344_v15  ;;  %v6396_v14 = vld [vmem:[#allocation2 + $0x808] ss:$16 sps:$4 sm:$0xff]   ;;  %v6401_v15 = vld [vmem:[#allocation2 + $0x7ec] ss:$16 sps:$4 sm:$0xff]  }
 0x1b9   :  { %4078 = vmatpush2.bf16.msra.mxu0 %v6339_v18  ;;  %v6404_v18 = vld [vmem:[#allocation2 + $0x9ec] ss:$16 sps:$4 sm:$0xff]  }
 0x1ba   :  { %4119 = vmatpush2.bf16.msra.mxu1 %v6342_v28  ;;  %4079 = vmatprep.subr.bf16.mxu0 %v6347_v19  ;;  %v6399_v28 = vld [vmem:[#allocation2 + $0x7e8] ss:$16 sps:$4 sm:$0xff]  }
 0x1bb   :  { %4120 = vmatprep.subr.bf16.mxu1 %v6350_v51  ;;  %v6402_v19 = vld [vmem:[#allocation2 + $0x9e8] ss:$16 sps:$4 sm:$0xff]   ;;  %v6407_v51 = vld [vmem:[#allocation2 + $0x7cc] ss:$16 sps:$4 sm:$0xff]  }
 0x1bd   :  { %4080 = vmatpush2.bf16.msra.mxu0 %v6345_v36  ;;  %v6410_v36 = vld [vmem:[#allocation2 + $0x9cc] ss:$16 sps:$4 sm:$0xff]  }
 0x1be   :  { %4121 = vmatpush2.bf16.msra.mxu1 %v6348_v21  ;;  %4131 = vmatprep.subr.bf16.mxu0 %v6353_v26  ;;  %v6405_v21 = vld [vmem:[#allocation2 + $0x7c8] ss:$16 sps:$4 sm:$0xff]  }
 0x1bf   :  { %4172 = vmatprep.subr.bf16.mxu1 %v6356_v27  ;;  %v6408_v26 = vld [vmem:[#allocation2 + $0x9c8] ss:$16 sps:$4 sm:$0xff]   ;;  %v6413_v27 = vld [vmem:[#allocation2 + $0x7ac] ss:$16 sps:$4 sm:$0xff]  }
 0x1c0   :  { %v3837_v41 = vpop.f32.mrf.mxu0  ;;  %4082 = vmatmul.mubr.bf16.vlgmr.msra.gmra.mxu0 %v6936_v7 }
 0x1c1   :  { %v3878_v42 = vpop.f32.mrf.mxu1  ;;  %4123 = vmatmul.mubr.bf16.vlgmr.msra.gmra.mxu1 %v6962_v16  ;;  %v3838_v47 = vadd.f32 %v3837_v41, %v7060_v40  ;;  %4132 = vmatpush1.bf16.msra.mxu0 %v6351_v29  ;;  %v6416_v29 = vld [vmem:[#allocation2 + $0x9ac] ss:$16 sps:$4 sm:$0xff]   ;;  %v6420_v41 = vld [vmem:[#allocation2 + $0x988] ss:$16 sps:$4 sm:$0xff]  }
 0x1c2   :  { %4173 = vmatpush1.bf16.msra.mxu1 %v6354_v30  ;;  %v3839_v43 = vpop.f32.mrf.mxu0  ;;  %4133 = vmatprep.subr.bf16.mxu0 %v6359_v31  ;;  %v6411_v30 = vld [vmem:[#allocation2 + $0x7a8] ss:$16 sps:$4 sm:$0xff]  }
 0x1c3   :  { %v3880_v44 = vpop.f32.mrf.mxu1  ;;  %4174 = vmatprep.subr.bf16.mxu1 %v6362_v32  ;;  %v7070_v48 = vadd.f32 %v3878_v42, %v3838_v47  ;;  %v3840_v49 = vadd.f32 %v3839_v43, %v7065_v12  ;;  %4163 = vmatprep.mubr.bf16.mxu0 %v6956_v37  ;;  %v6369_v12 = vld [vmem:[#allocation2 + $0x688] ss:$16 sps:$4 sm:$0xff]   ;;  %v6377_v37 = vld [vmem:[#allocation2 + $0x66c] ss:$16 sps:$4 sm:$0xff]  }
 0x1c4   :  { %4204 = vmatprep.mubr.bf16.mxu1 %v6980_v24  ;;  %v3841_v7 = vpop.f32.mrf.mxu0  ;;  %v6380_v24 = vld [vmem:[#allocation2 + $0x86c] ss:$16 sps:$4 sm:$0xff]   ;;  %v6414_v31 = vld [vmem:[#allocation2 + $0x9a8] ss:$16 sps:$4 sm:$0xff]  }
 0x1c5   :  { %v3882_v16 = vpop.f32.mrf.mxu1  ;;  %v7075_v40 = vadd.f32 %v3880_v44, %v3840_v49  ;;  %4134 = vmatpush1.bf16.msra.mxu0 %v6357_v33  ;;  %v6419_v32 = vld [vmem:[#allocation2 + $0x78c] ss:$16 sps:$4 sm:$0xff]   ;;  %v6423_v43 = vld [vmem:[#allocation2 + $0x768] ss:$16 sps:$4 sm:$0xff]  }
 0x1c6   :  { %4175 = vmatpush1.bf16.msra.mxu1 %v6360_v34  ;;  %v3842_v54 = vpop.f32.mrf.mxu0  ;;  %4135 = vmatprep.subr.bf16.mxu0 %v6365_v45  ;;  %v6422_v33 = vld [vmem:[#allocation2 + $0x98c] ss:$16 sps:$4 sm:$0xff]   ;;  %v6417_v34 = vld [vmem:[#allocation2 + $0x788] ss:$16 sps:$4 sm:$0xff]  }
 0x1c7   :  { %v3883_v56 = vpop.f32.mrf.mxu1  ;;  %4176 = vmatprep.subr.bf16.mxu1 %v6368_v46  ;;  %v6425_v42 = vld [vmem:[#allocation2 + $0x76c] ss:$16 sps:$4 sm:$0xff]   ;;  %v6426_v44 = vld [vmem:[#allocation2 + $0x968] ss:$16 sps:$4 sm:$0xff]  }
 0x1c8   :  { %v6428_v47 = vld [vmem:[#allocation2 + $0x96c] ss:$16 sps:$4 sm:$0xff]   ;;  %v6429_v49 = vld [vmem:[#allocation2 + $0x748] ss:$16 sps:$4 sm:$0xff]  }
 0x1c9   :  { %4136 = vmatpush1.bf16.msra.mxu0 %v6363_v50  ;;  %v6431_v45 = vld [vmem:[#allocation2 + $0x74c] ss:$16 sps:$4 sm:$0xff]   ;;  %v6432_v50 = vld [vmem:[#allocation2 + $0x948] ss:$16 sps:$4 sm:$0xff]  }
 0x1ca   :  { %4177 = vmatpush1.bf16.msra.mxu1 %v6366_v52  ;;  %4137 = vmatprep.subr.bf16.mxu0 %v6371_v57  ;;  %v6434_v46 = vld [vmem:[#allocation2 + $0x94c] ss:$16 sps:$4 sm:$0xff]   ;;  %v6435_v16 = vld [vmem:[#allocation2 + $0x728] ss:$16 sps:$4 sm:$0xff]  }
 0x1cb   :  { %4178 = vmatprep.subr.bf16.mxu1 %v6374_v58  ;;  %v6437_v52 = vld [vmem:[#allocation2 + $0x72c] ss:$16 sps:$4 sm:$0xff]   ;;  %v6438_v54 = vld [vmem:[#allocation2 + $0x928] ss:$16 sps:$4 sm:$0xff]  }
 0x1cc   :  { %v6440_v7 = vld [vmem:[#allocation2 + $0x92c] ss:$16 sps:$4 sm:$0xff]   ;;  %v6441_v58 = vld [vmem:[#allocation2 + $0x708] ss:$16 sps:$4 sm:$0xff]  }
 0x1cd   :  { %4138 = vmatpush1.bf16.msra.mxu0 %v6369_v12  ;;  %v6443_v56 = vld [vmem:[#allocation2 + $0x70c] ss:$16 sps:$4 sm:$0xff]   ;;  %v6444_v12 = vld [vmem:[#allocation2 + $0x908] ss:$16 sps:$4 sm:$0xff]  }
 0x1ce   :  { %4179 = vmatpush1.bf16.msra.mxu1 %v6372_v60  ;;  %4139 = vmatprep.subr.bf16.mxu0 %v6377_v37  ;;  %v6446_v57 = vld [vmem:[#allocation2 + $0x90c] ss:$16 sps:$4 sm:$0xff]  }
 0x1cf   :  { %4180 = vmatprep.subr.bf16.mxu1 %v6380_v24  ;;  %v6449_v60 = vld [vmem:[#allocation2 + $0xaec] ss:$16 sps:$4 sm:$0xff]   ;;  %v6447_v24 = vld [vmem:[#allocation2 + $0xae8] ss:$16 sps:$4 sm:$0xff]  }
 0x1d0   :  { %v6452_v37 = vld [vmem:[#allocation2 + $0xcec] ss:$16 sps:$4 sm:$0xff]  }
 0x1d1   :  { %4140 = vmatpush1.bf16.msra.mxu0 %v6375_v61  ;;  %v6450_v61 = vld [vmem:[#allocation2 + $0xce8] ss:$16 sps:$4 sm:$0xff]  }
 0x1d2   :  { %4181 = vmatpush1.bf16.msra.mxu1 %v6378_v2  ;;  %4141 = vmatprep.subr.bf16.mxu0 %v6383_v3  ;;  %v6455_v2 = vld [vmem:[#allocation2 + $0xacc] ss:$16 sps:$4 sm:$0xff]  }
 0x1d3   :  { %4182 = vmatprep.subr.bf16.mxu1 %v6386_v1  ;;  %v6458_v3 = vld [vmem:[#allocation2 + $0xccc] ss:$16 sps:$4 sm:$0xff]  }
 0x1d5   :  { %4142 = vmatpush1.bf16.msra.mxu0 %v6381_v4 }
 0x1d6   :  { %4183 = vmatpush1.bf16.msra.mxu1 %v6384_v35  ;;  %4143 = vmatprep.subr.bf16.mxu0 %v6389_v5  ;;  %v6453_v5 = vld [vmem:[#allocation2 + $0xac8] ss:$16 sps:$4 sm:$0xff]  }
 0x1d7   :  { %4184 = vmatprep.subr.bf16.mxu1 %v6392_v9  ;;  %v6456_v9 = vld [vmem:[#allocation2 + $0xcc8] ss:$16 sps:$4 sm:$0xff]  }
 0x1d9   :  { %4144 = vmatpush1.bf16.msra.mxu0 %v6387_v10 }
 0x1da   :  { %4185 = vmatpush1.bf16.msra.mxu1 %v6390_v11  ;;  %4145 = vmatprep.subr.bf16.mxu0 %v6395_v6  ;;  %v6461_v6 = vld [vmem:[#allocation2 + $0xaac] ss:$16 sps:$4 sm:$0xff]  }
 0x1db   :  { %4186 = vmatprep.subr.bf16.mxu1 %v6398_v20  ;;  %v6464_v20 = vld [vmem:[#allocation2 + $0xcac] ss:$16 sps:$4 sm:$0xff]  }
 0x1dd   :  { %4146 = vmatpush1.bf16.msra.mxu0 %v6393_v13 }
 0x1de   :  { %4187 = vmatpush1.bf16.msra.mxu1 %v6396_v14  ;;  %4147 = vmatprep.subr.bf16.mxu0 %v6401_v15  ;;  %v6459_v15 = vld [vmem:[#allocation2 + $0xaa8] ss:$16 sps:$4 sm:$0xff]  }
 0x1df   :  { %4188 = vmatprep.subr.bf16.mxu1 %v6404_v18  ;;  %v6462_v18 = vld [vmem:[#allocation2 + $0xca8] ss:$16 sps:$4 sm:$0xff]  }
 0x1e1   :  { %4148 = vmatpush2.bf16.msra.mxu0 %v6399_v28 }
 0x1e2   :  { %4189 = vmatpush2.bf16.msra.mxu1 %v6402_v19  ;;  %4149 = vmatprep.subr.bf16.mxu0 %v6407_v51  ;;  %v6467_v51 = vld [vmem:[#allocation2 + $0xa8c] ss:$16 sps:$4 sm:$0xff]  }
 0x1e3   :  { %4190 = vmatprep.subr.bf16.mxu1 %v6410_v36  ;;  %v6470_v36 = vld [vmem:[#allocation2 + $0xc8c] ss:$16 sps:$4 sm:$0xff]  }
 0x1e5   :  { %4150 = vmatpush2.bf16.msra.mxu0 %v6405_v21  ;;  %v6476_v21 = vld [vmem:[#allocation2 + $0xc6c] ss:$16 sps:$4 sm:$0xff]  }
 0x1e6   :  { %4191 = vmatpush2.bf16.msra.mxu1 %v6408_v26  ;;  %4151 = vmatprep.subr.bf16.mxu0 %v6413_v27  ;;  %v6471_v26 = vld [vmem:[#allocation2 + $0xa68] ss:$16 sps:$4 sm:$0xff]  }
 0x1e7   :  { %4192 = vmatprep.subr.bf16.mxu1 %v6416_v29  ;;  %v6474_v27 = vld [vmem:[#allocation2 + $0xc68] ss:$16 sps:$4 sm:$0xff]   ;;  %v6479_v29 = vld [vmem:[#allocation2 + $0xa4c] ss:$16 sps:$4 sm:$0xff]  }
 0x1e9   :  { %4152 = vmatpush2.bf16.msra.mxu0 %v6411_v30  ;;  %v6482_v30 = vld [vmem:[#allocation2 + $0xc4c] ss:$16 sps:$4 sm:$0xff]  }
 0x1ea   :  { %4193 = vmatpush2.bf16.msra.mxu1 %v6414_v31  ;;  %4153 = vmatprep.subr.bf16.mxu0 %v6419_v32  ;;  %v6477_v31 = vld [vmem:[#allocation2 + $0xa48] ss:$16 sps:$4 sm:$0xff]  }
 0x1eb   :  { %4194 = vmatprep.subr.bf16.mxu1 %v6422_v33  ;;  %v6480_v32 = vld [vmem:[#allocation2 + $0xc48] ss:$16 sps:$4 sm:$0xff]   ;;  %v6485_v33 = vld [vmem:[#allocation2 + $0xa2c] ss:$16 sps:$4 sm:$0xff]  }
 0x1ed   :  { %4154 = vmatpush2.bf16.msra.mxu0 %v6417_v34  ;;  %v6488_v34 = vld [vmem:[#allocation2 + $0xc2c] ss:$16 sps:$4 sm:$0xff]  }
 0x1ee   :  { %4195 = vmatpush2.bf16.msra.mxu1 %v6420_v41  ;;  %4155 = vmatprep.subr.bf16.mxu0 %v6425_v42  ;;  %v6483_v41 = vld [vmem:[#allocation2 + $0xa28] ss:$16 sps:$4 sm:$0xff]  }
 0x1ef   :  { %4196 = vmatprep.subr.bf16.mxu1 %v6428_v47  ;;  %v6486_v42 = vld [vmem:[#allocation2 + $0xc28] ss:$16 sps:$4 sm:$0xff]   ;;  %v6491_v47 = vld [vmem:[#allocation2 + $0xa0c] ss:$16 sps:$4 sm:$0xff]  }
 0x1f1   :  { %4156 = vmatpush2.bf16.msra.mxu0 %v6423_v43  ;;  %v6494_v43 = vld [vmem:[#allocation2 + $0xc0c] ss:$16 sps:$4 sm:$0xff]  }
 0x1f2   :  { %4197 = vmatpush2.bf16.msra.mxu1 %v6426_v44  ;;  %4157 = vmatprep.subr.bf16.mxu0 %v6431_v45  ;;  %v6489_v44 = vld [vmem:[#allocation2 + $0xa08] ss:$16 sps:$4 sm:$0xff]  }
 0x1f3   :  { %4198 = vmatprep.subr.bf16.mxu1 %v6434_v46  ;;  %v6492_v45 = vld [vmem:[#allocation2 + $0xc08] ss:$16 sps:$4 sm:$0xff]   ;;  %v6497_v46 = vld [vmem:[#allocation2 + $0xbec] ss:$16 sps:$4 sm:$0xff]  }
 0x1f5   :  { %4158 = vmatpush2.bf16.msra.mxu0 %v6429_v49  ;;  %v6500_v49 = vld [vmem:[#allocation2 + $0xdec] ss:$16 sps:$4 sm:$0xff]  }
 0x1f6   :  { %4199 = vmatpush2.bf16.msra.mxu1 %v6432_v50  ;;  %4159 = vmatprep.subr.bf16.mxu0 %v6437_v52  ;;  %v6495_v50 = vld [vmem:[#allocation2 + $0xbe8] ss:$16 sps:$4 sm:$0xff]  }
 0x1f7   :  { %4200 = vmatprep.subr.bf16.mxu1 %v6440_v7  ;;  %v6498_v52 = vld [vmem:[#allocation2 + $0xde8] ss:$16 sps:$4 sm:$0xff]   ;;  %v6503_v7 = vld [vmem:[#allocation2 + $0xbcc] ss:$16 sps:$4 sm:$0xff]  }
 0x1f9   :  { %4160 = vmatpush2.bf16.msra.mxu0 %v6435_v16  ;;  %v6506_v16 = vld [vmem:[#allocation2 + $0xdcc] ss:$16 sps:$4 sm:$0xff]  }
 0x1fa   :  { %4201 = vmatpush2.bf16.msra.mxu1 %v6438_v54  ;;  %4161 = vmatprep.subr.bf16.mxu0 %v6443_v56  ;;  %v6501_v54 = vld [vmem:[#allocation2 + $0xbc8] ss:$16 sps:$4 sm:$0xff]  }
 0x1fb   :  { %4202 = vmatprep.subr.bf16.mxu1 %v6446_v57  ;;  %v6504_v56 = vld [vmem:[#allocation2 + $0xdc8] ss:$16 sps:$4 sm:$0xff]   ;;  %v6509_v57 = vld [vmem:[#allocation2 + $0xbac] ss:$16 sps:$4 sm:$0xff]  }
 0x1fd   :  { %4162 = vmatpush2.bf16.msra.mxu0 %v6441_v58  ;;  %v6512_v58 = vld [vmem:[#allocation2 + $0xdac] ss:$16 sps:$4 sm:$0xff]  }
 0x1fe   :  { %4203 = vmatpush2.bf16.msra.mxu1 %v6444_v12  ;;  %4213 = vmatprep.subr.bf16.mxu0 %v6449_v60  ;;  %v6507_v12 = vld [vmem:[#allocation2 + $0xba8] ss:$16 sps:$4 sm:$0xff]  }
 0x1ff   :  { %4254 = vmatprep.subr.bf16.mxu1 %v6452_v37  ;;  %v6510_v60 = vld [vmem:[#allocation2 + $0xda8] ss:$16 sps:$4 sm:$0xff]   ;;  %v6515_v37 = vld [vmem:[#allocation2 + $0xb8c] ss:$16 sps:$4 sm:$0xff]  }
 0x200   :  { %v3919_v1 = vpop.f32.mrf.mxu0  ;;  %4164 = vmatmul.mubr.bf16.vlgmr.msra.gmra.mxu0 %v6966_v17 }
 0x201   :  { %v3960_v4 = vpop.f32.mrf.mxu1  ;;  %4205 = vmatmul.mubr.bf16.vlgmr.msra.gmra.mxu1 %v6997_v38  ;;  %v3920_v35 = vadd.f32 %v3919_v1, %v7070_v48  ;;  %4214 = vmatpush1.bf16.msra.mxu0 %v6447_v24  ;;  %v6518_v24 = vld [vmem:[#allocation2 + $0xd8c] ss:$16 sps:$4 sm:$0xff]  }
 0x202   :  { %4255 = vmatpush1.bf16.msra.mxu1 %v6450_v61  ;;  %v3921_v10 = vpop.f32.mrf.mxu0  ;;  %4215 = vmatprep.subr.bf16.mxu0 %v6455_v2  ;;  %v6513_v61 = vld [vmem:[#allocation2 + $0xb88] ss:$16 sps:$4 sm:$0xff]   ;;  %v6524_v1 = vld [vmem:[#allocation2 + $0xd6c] ss:$16 sps:$4 sm:$0xff]  }
 0x203   :  { %v3962_v11 = vpop.f32.mrf.mxu1  ;;  %4256 = vmatprep.subr.bf16.mxu1 %v6458_v3  ;;  %v7080_v13 = vadd.f32 %v3960_v4, %v3920_v35  ;;  %v3922_v14 = vadd.f32 %v3921_v10, %v7075_v40  ;;  %4245 = vmatprep.mubr.bf16.mxu0 %v6984_v25  ;;  %v6465_v40 = vld [vmem:[#allocation2 + $0xa88] ss:$16 sps:$4 sm:$0xff]   ;;  %v6521_v3 = vld [vmem:[#allocation2 + $0xb6c] ss:$16 sps:$4 sm:$0xff]  }
 0x204   :  { %4286 = vmatprep.mubr.bf16.mxu1 %v7010_v22  ;;  %v3923_v17 = vpop.f32.mrf.mxu0  ;;  %v6468_v25 = vld [vmem:[#allocation2 + $0xc88] ss:$16 sps:$4 sm:$0xff]   ;;  %v6473_v22 = vld [vmem:[#allocation2 + $0xa6c] ss:$16 sps:$4 sm:$0xff]  }
 0x205   :  { %v3964_v38 = vpop.f32.mrf.mxu1  ;;  %v7085_v48 = vadd.f32 %v3962_v11, %v3922_v14  ;;  %4216 = vmatpush1.bf16.msra.mxu0 %v6453_v5  ;;  %v6516_v2 = vld [vmem:[#allocation2 + $0xd88] ss:$16 sps:$4 sm:$0xff]   ;;  %v6527_v5 = vld [vmem:[#allocation2 + $0xb4c] ss:$16 sps:$4 sm:$0xff]  }
 0x206   :  { %4257 = vmatpush1.bf16.msra.mxu1 %v6456_v9  ;;  %v3924_v28 = vpop.f32.mrf.mxu0  ;;  %4217 = vmatprep.subr.bf16.mxu0 %v6461_v6  ;;  %v6519_v4 = vld [vmem:[#allocation2 + $0xb68] ss:$16 sps:$4 sm:$0xff]   ;;  %v6530_v9 = vld [vmem:[#allocation2 + $0xd4c] ss:$16 sps:$4 sm:$0xff]  }
 0x207   :  { %v3965_v19 = vpop.f32.mrf.mxu1  ;;  %4258 = vmatprep.subr.bf16.mxu1 %v6464_v20  ;;  %v6522_v35 = vld [vmem:[#allocation2 + $0xd68] ss:$16 sps:$4 sm:$0xff]   ;;  %v6533_v6 = vld [vmem:[#allocation2 + $0xb2c] ss:$16 sps:$4 sm:$0xff]  }
 0x208   :  { %v6525_v10 = vld [vmem:[#allocation2 + $0xb48] ss:$16 sps:$4 sm:$0xff]   ;;  %v6536_v20 = vld [vmem:[#allocation2 + $0xd2c] ss:$16 sps:$4 sm:$0xff]  }
 0x209   :  { %4218 = vmatpush1.bf16.msra.mxu0 %v6459_v15  ;;  %v6528_v11 = vld [vmem:[#allocation2 + $0xd48] ss:$16 sps:$4 sm:$0xff]   ;;  %v6539_v38 = vld [vmem:[#allocation2 + $0xb0c] ss:$16 sps:$4 sm:$0xff]  }
 0x20a   :  { %4259 = vmatpush1.bf16.msra.mxu1 %v6462_v18  ;;  %4219 = vmatprep.subr.bf16.mxu0 %v6467_v51  ;;  %v6531_v14 = vld [vmem:[#allocation2 + $0xb28] ss:$16 sps:$4 sm:$0xff]   ;;  %v6542_v15 = vld [vmem:[#allocation2 + $0xd0c] ss:$16 sps:$4 sm:$0xff]  }
 0x20b   :  { %4260 = vmatprep.subr.bf16.mxu1 %v6470_v36  ;;  %v6534_v17 = vld [vmem:[#allocation2 + $0xd28] ss:$16 sps:$4 sm:$0xff]   ;;  %v6545_v19 = vld [vmem:[#allocation2 + $0xeec] ss:$16 sps:$4 sm:$0xff]  }
 0x20c   :  { %v6537_v18 = vld [vmem:[#allocation2 + $0xb08] ss:$16 sps:$4 sm:$0xff]   ;;  %v6548_v51 = vld [vmem:[#allocation2 + $0x10ec] ss:$16 sps:$4 sm:$0xff]  }
 0x20d   :  { %4220 = vmatpush1.bf16.msra.mxu0 %v6465_v40  ;;  %v6540_v28 = vld [vmem:[#allocation2 + $0xd08] ss:$16 sps:$4 sm:$0xff]  }
 0x20e   :  { %4261 = vmatpush1.bf16.msra.mxu1 %v6468_v25  ;;  %4221 = vmatprep.subr.bf16.mxu0 %v6473_v22  ;;  %v6543_v36 = vld [vmem:[#allocation2 + $0xee8] ss:$16 sps:$4 sm:$0xff]   ;;  %v6551_v25 = vld [vmem:[#allocation2 + $0xecc] ss:$16 sps:$4 sm:$0xff]  }
 0x20f   :  { %4262 = vmatprep.subr.bf16.mxu1 %v6476_v21  ;;  %v6546_v40 = vld [vmem:[#allocation2 + $0x10e8] ss:$16 sps:$4 sm:$0xff]   ;;  %v6554_v22 = vld [vmem:[#allocation2 + $0x10cc] ss:$16 sps:$4 sm:$0xff]  }
 0x211   :  { %4222 = vmatpush1.bf16.msra.mxu0 %v6471_v26 }
 0x212   :  { %4263 = vmatpush1.bf16.msra.mxu1 %v6474_v27  ;;  %4223 = vmatprep.subr.bf16.mxu0 %v6479_v29  ;;  %v6549_v29 = vld [vmem:[#allocation2 + $0xec8] ss:$16 sps:$4 sm:$0xff]  }
 0x213   :  { %4264 = vmatprep.subr.bf16.mxu1 %v6482_v30  ;;  %v6552_v30 = vld [vmem:[#allocation2 + $0x10c8] ss:$16 sps:$4 sm:$0xff]  }
 0x215   :  { %4224 = vmatpush1.bf16.msra.mxu0 %v6477_v31 }
 0x216   :  { %4265 = vmatpush1.bf16.msra.mxu1 %v6480_v32  ;;  %4225 = vmatprep.subr.bf16.mxu0 %v6485_v33  ;;  %v6557_v33 = vld [vmem:[#allocation2 + $0xeac] ss:$16 sps:$4 sm:$0xff]  }
 0x217   :  { %4266 = vmatprep.subr.bf16.mxu1 %v6488_v34  ;;  %v6560_v34 = vld [vmem:[#allocation2 + $0x10ac] ss:$16 sps:$4 sm:$0xff]  }
 0x219   :  { %4226 = vmatpush1.bf16.msra.mxu0 %v6483_v41  ;;  %v6558_v41 = vld [vmem:[#allocation2 + $0x10a8] ss:$16 sps:$4 sm:$0xff]  }
 0x21a   :  { %4267 = vmatpush1.bf16.msra.mxu1 %v6486_v42  ;;  %4227 = vmatprep.subr.bf16.mxu0 %v6491_v47 }
 0x21b   :  { %4268 = vmatprep.subr.bf16.mxu1 %v6494_v43  ;;  %v6563_v43 = vld [vmem:[#allocation2 + $0xe8c] ss:$16 sps:$4 sm:$0xff]  }
 0x21d   :  { %4228 = vmatpush1.bf16.msra.mxu0 %v6489_v44  ;;  %v6566_v44 = vld [vmem:[#allocation2 + $0x108c] ss:$16 sps:$4 sm:$0xff]  }
 0x21e   :  { %4269 = vmatpush1.bf16.msra.mxu1 %v6492_v45  ;;  %4229 = vmatprep.subr.bf16.mxu0 %v6497_v46  ;;  %v6561_v45 = vld [vmem:[#allocation2 + $0xe88] ss:$16 sps:$4 sm:$0xff]  }
 0x21f   :  { %4270 = vmatprep.subr.bf16.mxu1 %v6500_v49  ;;  %v6564_v46 = vld [vmem:[#allocation2 + $0x1088] ss:$16 sps:$4 sm:$0xff]  }
 0x220   :  { %v6567_v49 = vld [vmem:[#allocation2 + $0xe68] ss:$16 sps:$4 sm:$0xff]  }
 0x221   :  { %4230 = vmatpush2.bf16.msra.mxu0 %v6495_v50  ;;  %v6570_v50 = vld [vmem:[#allocation2 + $0x1068] ss:$16 sps:$4 sm:$0xff]  }
 0x222   :  { %4271 = vmatpush2.bf16.msra.mxu1 %v6498_v52  ;;  %4231 = vmatprep.subr.bf16.mxu0 %v6503_v7  ;;  %v6575_v52 = vld [vmem:[#allocation2 + $0xe4c] ss:$16 sps:$4 sm:$0xff]  }
 0x223   :  { %4272 = vmatprep.subr.bf16.mxu1 %v6506_v16  ;;  %v6578_v7 = vld [vmem:[#allocation2 + $0x104c] ss:$16 sps:$4 sm:$0xff]   ;;  %v6573_v16 = vld [vmem:[#allocation2 + $0xe48] ss:$16 sps:$4 sm:$0xff]  }
 0x225   :  { %4232 = vmatpush2.bf16.msra.mxu0 %v6501_v54  ;;  %v6576_v54 = vld [vmem:[#allocation2 + $0x1048] ss:$16 sps:$4 sm:$0xff]  }
 0x226   :  { %4273 = vmatpush2.bf16.msra.mxu1 %v6504_v56  ;;  %4233 = vmatprep.subr.bf16.mxu0 %v6509_v57  ;;  %v6581_v56 = vld [vmem:[#allocation2 + $0xe2c] ss:$16 sps:$4 sm:$0xff]  }
 0x227   :  { %4274 = vmatprep.subr.bf16.mxu1 %v6512_v58  ;;  %v6584_v57 = vld [vmem:[#allocation2 + $0x102c] ss:$16 sps:$4 sm:$0xff]   ;;  %v6579_v58 = vld [vmem:[#allocation2 + $0xe28] ss:$16 sps:$4 sm:$0xff]  }
 0x229   :  { %4234 = vmatpush2.bf16.msra.mxu0 %v6507_v12  ;;  %v6582_v12 = vld [vmem:[#allocation2 + $0x1028] ss:$16 sps:$4 sm:$0xff]  }
 0x22a   :  { %4275 = vmatpush2.bf16.msra.mxu1 %v6510_v60  ;;  %4235 = vmatprep.subr.bf16.mxu0 %v6515_v37  ;;  %v6587_v60 = vld [vmem:[#allocation2 + $0xe0c] ss:$16 sps:$4 sm:$0xff]  }
 0x22b   :  { %4276 = vmatprep.subr.bf16.mxu1 %v6518_v24  ;;  %v6590_v37 = vld [vmem:[#allocation2 + $0x100c] ss:$16 sps:$4 sm:$0xff]   ;;  %v6585_v24 = vld [vmem:[#allocation2 + $0xe08] ss:$16 sps:$4 sm:$0xff]  }
 0x22d   :  { %4236 = vmatpush2.bf16.msra.mxu0 %v6513_v61  ;;  %v6588_v61 = vld [vmem:[#allocation2 + $0x1008] ss:$16 sps:$4 sm:$0xff]  }
 0x22e   :  { %4277 = vmatpush2.bf16.msra.mxu1 %v6516_v2  ;;  %4237 = vmatprep.subr.bf16.mxu0 %v6521_v3  ;;  %v6593_v2 = vld [vmem:[#allocation2 + $0xfec] ss:$16 sps:$4 sm:$0xff]  }
 0x22f   :  { %4278 = vmatprep.subr.bf16.mxu1 %v6524_v1  ;;  %v6596_v3 = vld [vmem:[#allocation2 + $0x11ec] ss:$16 sps:$4 sm:$0xff]   ;;  %v6591_v1 = vld [vmem:[#allocation2 + $0xfe8] ss:$16 sps:$4 sm:$0xff]  }
 0x231   :  { %4238 = vmatpush2.bf16.msra.mxu0 %v6519_v4  ;;  %v6594_v4 = vld [vmem:[#allocation2 + $0x11e8] ss:$16 sps:$4 sm:$0xff]  }
 0x232   :  { %4279 = vmatpush2.bf16.msra.mxu1 %v6522_v35  ;;  %4239 = vmatprep.subr.bf16.mxu0 %v6527_v5  ;;  %v6599_v35 = vld [vmem:[#allocation2 + $0xfcc] ss:$16 sps:$4 sm:$0xff]  }
 0x233   :  { %4280 = vmatprep.subr.bf16.mxu1 %v6530_v9  ;;  %v6602_v5 = vld [vmem:[#allocation2 + $0x11cc] ss:$16 sps:$4 sm:$0xff]   ;;  %v6597_v9 = vld [vmem:[#allocation2 + $0xfc8] ss:$16 sps:$4 sm:$0xff]  }
 0x235   :  { %4240 = vmatpush2.bf16.msra.mxu0 %v6525_v10  ;;  %v6600_v10 = vld [vmem:[#allocation2 + $0x11c8] ss:$16 sps:$4 sm:$0xff]  }
 0x236   :  { %4281 = vmatpush2.bf16.msra.mxu1 %v6528_v11  ;;  %4241 = vmatprep.subr.bf16.mxu0 %v6533_v6  ;;  %v6605_v11 = vld [vmem:[#allocation2 + $0xfac] ss:$16 sps:$4 sm:$0xff]  }
 0x237   :  { %4282 = vmatprep.subr.bf16.mxu1 %v6536_v20  ;;  %v6608_v6 = vld [vmem:[#allocation2 + $0x11ac] ss:$16 sps:$4 sm:$0xff]   ;;  %v6603_v20 = vld [vmem:[#allocation2 + $0xfa8] ss:$16 sps:$4 sm:$0xff]  }
 0x239   :  { %4242 = vmatpush2.bf16.msra.mxu0 %v6531_v14  ;;  %v6606_v14 = vld [vmem:[#allocation2 + $0x11a8] ss:$16 sps:$4 sm:$0xff]  }
 0x23a   :  { %4283 = vmatpush2.bf16.msra.mxu1 %v6534_v17  ;;  %4243 = vmatprep.subr.bf16.mxu0 %v6539_v38  ;;  %v6611_v17 = vld [vmem:[#allocation2 + $0xf8c] ss:$16 sps:$4 sm:$0xff]  }
 0x23b   :  { %4284 = vmatprep.subr.bf16.mxu1 %v6542_v15  ;;  %v6614_v38 = vld [vmem:[#allocation2 + $0x118c] ss:$16 sps:$4 sm:$0xff]   ;;  %v6609_v15 = vld [vmem:[#allocation2 + $0xf88] ss:$16 sps:$4 sm:$0xff]  }
 0x23d   :  { %4244 = vmatpush2.bf16.msra.mxu0 %v6537_v18  ;;  %v6612_v18 = vld [vmem:[#allocation2 + $0x1188] ss:$16 sps:$4 sm:$0xff]  }
 0x23e   :  { %4285 = vmatpush2.bf16.msra.mxu1 %v6540_v28  ;;  %4295 = vmatprep.subr.bf16.mxu0 %v6545_v19  ;;  %v6617_v28 = vld [vmem:[#allocation2 + $0xf6c] ss:$16 sps:$4 sm:$0xff]  }
 0x23f   :  { %4336 = vmatprep.subr.bf16.mxu1 %v6548_v51  ;;  %v6620_v19 = vld [vmem:[#allocation2 + $0x116c] ss:$16 sps:$4 sm:$0xff]   ;;  %v6615_v51 = vld [vmem:[#allocation2 + $0xf68] ss:$16 sps:$4 sm:$0xff]  }
 0x240   :  { %v4001_v21 = vpop.f32.mrf.mxu0  ;;  %4246 = vmatmul.mubr.bf16.vlgmr.msra.gmra.mxu0 %v7001_v39 }
 0x241   :  { %v7087_v26 = vpop.f32.mrf.mxu1  ;;  %4287 = vmatmul.mubr.bf16.vlgmr.msra.gmra.mxu1 %v7026_v63  ;;  %v7092_v27 = vadd.f32 %v4001_v21, %v7080_v13  ;;  %4296 = vmatpush1.bf16.msra.mxu0 %v6543_v36  ;;  %v6555_v13 = vld [vmem:[#allocation2 + $0xea8] ss:$16 sps:$4 sm:$0xff]  }
 0x242   :  { %4337 = vmatpush1.bf16.msra.mxu1 %v6546_v40  ;;  %v7094_v31 = vpop.f32.mrf.mxu0  ;;  %4297 = vmatprep.subr.bf16.mxu0 %v6551_v25  ;;  %v6618_v36 = vld [vmem:[#allocation2 + $0x1168] ss:$16 sps:$4 sm:$0xff]   ;;  %v6623_v40 = vld [vmem:[#allocation2 + $0xf4c] ss:$16 sps:$4 sm:$0xff]  }
 0x243   :  { %v7096_v32 = vpop.f32.mrf.mxu1  ;;  %4338 = vmatprep.subr.bf16.mxu1 %v6554_v22  ;;  %4327 = vmatprep.mubr.bf16.mxu0 %v7014_v23  ;;  %v6569_v23 = vld [vmem:[#allocation2 + $0xe6c] ss:$16 sps:$4 sm:$0xff]   ;;  %v6621_v22 = vld [vmem:[#allocation2 + $0xf48] ss:$16 sps:$4 sm:$0xff]  }
 0x244   :  { %4368 = vmatprep.mubr.bf16.mxu1 %v7043_v8  ;;  %v4005_v39 = vpop.f32.mrf.mxu0  ;;  %v6572_v8 = vld [vmem:[#allocation2 + $0x106c] ss:$16 sps:$4 sm:$0xff]   ;;  %v6624_v21 = vld [vmem:[#allocation2 + $0x1148] ss:$16 sps:$4 sm:$0xff]  }
 0x245   :  { %v4046_v63 = vpop.f32.mrf.mxu1  ;;  %4298 = vmatpush1.bf16.msra.mxu0 %v6549_v29  ;;  %v6626_v25 = vld [vmem:[#allocation2 + $0x114c] ss:$16 sps:$4 sm:$0xff]  }
 0x246   :  { %4339 = vmatpush1.bf16.msra.mxu1 %v6552_v30  ;;  %v4006_v42 = vpop.f32.mrf.mxu0  ;;  %4299 = vmatprep.subr.bf16.mxu0 %v6557_v33  ;;  %v6629_v29 = vld [vmem:[#allocation2 + $0xf2c] ss:$16 sps:$4 sm:$0xff]   ;;  %v6627_v33 = vld [vmem:[#allocation2 + $0xf28] ss:$16 sps:$4 sm:$0xff]  }
 0x247   :  { %v4047_v47 = vpop.f32.mrf.mxu1  ;;  %4340 = vmatprep.subr.bf16.mxu1 %v6560_v34  ;;  %v6632_v30 = vld [vmem:[#allocation2 + $0x112c] ss:$16 sps:$4 sm:$0xff]   ;;  %v6630_v34 = vld [vmem:[#allocation2 + $0x1128] ss:$16 sps:$4 sm:$0xff]   ;;  %v690_v42 = vsub.s32 3, %v7020_v53 }
 0x248   :  { %v6635_v39 = vld [vmem:[#allocation2 + $0xf0c] ss:$16 sps:$4 sm:$0xff]   ;;  %v6633_v47 = vld [vmem:[#allocation2 + $0xf08] ss:$16 sps:$4 sm:$0xff]  }
 0x249   :  { %4300 = vmatpush1.bf16.msra.mxu0 %v6555_v13  ;;  %v6638_v63 = vld [vmem:[#allocation2 + $0x110c] ss:$16 sps:$4 sm:$0xff]   ;;  %v686_v13 = vsub.s32 2, %v7020_v53 }
 0x24a   :  { %4341 = vmatpush1.bf16.msra.mxu1 %v6558_v41  ;;  %4301 = vmatprep.subr.bf16.mxu0 %v6563_v43  ;;  %v4004_v41 = vadd.f32 %v7094_v31, %v7085_v48  ;;  %v6636_v43 = vld [vmem:[#allocation2 + $0x1108] ss:$16 sps:$4 sm:$0xff]  }
 0x24b   :  { %4342 = vmatprep.subr.bf16.mxu1 %v6566_v44  ;;  %v6641_v44 = vld [vmem:[#allocation6 + $0x74] ss:$8 sps:$4 sm:$0xff]  }
 0x24d   :  { %4302 = vmatpush1.bf16.msra.mxu0 %v6561_v45  ;;  %v6751_v45 = vld [vmem:[#allocation4] sm:$0xf] }
 0x24e   :  { %4343 = vmatpush1.bf16.msra.mxu1 %v6564_v46  ;;  %4303 = vmatprep.subr.bf16.mxu0 %v6569_v23  ;;  %v687_v46 = vrot.slane %v6751_v45, %v686_v13  ;;  %v4378_v23 = vmax.f32 %v4004_v41, 0.0  ;;  %v6671_v13 = vld [vmem:[#allocation6 + $0xd4] ss:$8 sps:$4 sm:$0xff]  }
 0x24f   :  { %4344 = vmatprep.subr.bf16.mxu1 %v6572_v8  ;;  %v691_v8 = vrot.slane %v6751_v45, %v690_v42  ;;  %v6713_v41 = vld [vmem:[#allocation6 + $0x1f4] ss:$8 sps:$4 sm:$0xff]   ;;  %v6669_v42 = vld [vmem:[#allocation6 + $0xd0] ss:$8 sps:$4 sm:$0xff]   ;;  %v6672_v45 = vld [vmem:[#allocation6 + $0xc0] ss:$8 sps:$4 sm:$0xff]  }
 0x250   :  { %v4043_v48 = vadd.f32 %v7087_v26, %v687_v46  ;;  %v4382_v31 = vpack.c.bf16 %v4378_v23, %v4378_v23  ;;  %v6714_v46 = vld [vmem:[#allocation6 + $0x1e0] ss:$8 sps:$4 sm:$0xff]   ;;  %v6677_v23 = vld [vmem:[#allocation6 + $0xb4] ss:$8 sps:$4 sm:$0xff]  }
 0x251   :  { %4304 = vmatpush1.bf16.msra.mxu0 %v6567_v49  ;;  %v6639_v49 = vld [vmem:[#allocation6 + $0x70] ss:$8 sps:$4 sm:$0xff]  }
 0x252   :  { %4345 = vmatpush1.bf16.msra.mxu1 %v6570_v50  ;;  %4305 = vmatprep.subr.bf16.mxu0 %v6575_v52  ;;  %v6644_v50 = vld [vmem:[#allocation6 + $0x64] ss:$8 sps:$4 sm:$0xff]  }
 0x253   :  { %4346 = vmatprep.subr.bf16.mxu1 %v6578_v7 }
 0x255   :  { %4306 = vmatpush1.bf16.msra.mxu0 %v6573_v16  ;;  %v4045_v16 = vadd.f32 %v7096_v32, %v691_v8  ;;  %v6650_v32 = vld [vmem:[#allocation6 + $0x44] ss:$8 sps:$4 sm:$0xff]   ;;  %v6719_v8 = vld [vmem:[#allocation6 + $0x1d4] ss:$8 sps:$4 sm:$0xff]  }
 0x256   :  { %4347 = vmatpush1.bf16.msra.mxu1 %v6576_v54  ;;  %4307 = vmatprep.subr.bf16.mxu0 %v6581_v56  ;;  %v6642_v56 = vld [vmem:[#allocation6 + $0x60] ss:$8 sps:$4 sm:$0xff]  }
 0x257   :  { %4348 = vmatprep.subr.bf16.mxu1 %v6584_v57 }
 0x259   :  { %4308 = vmatpush1.bf16.msra.mxu0 %v6579_v58 }
 0x25a   :  { %4349 = vmatpush1.bf16.msra.mxu1 %v6582_v12  ;;  %4309 = vmatprep.subr.bf16.mxu0 %v6587_v60  ;;  %v6647_v12 = vld [vmem:[#allocation6 + $0x54] ss:$8 sps:$4 sm:$0xff]  }
 0x25b   :  { %4350 = vmatprep.subr.bf16.mxu1 %v6590_v37 }
 0x25d   :  { %4310 = vmatpush1.bf16.msra.mxu0 %v6585_v24 }
 0x25e   :  { %4351 = vmatpush1.bf16.msra.mxu1 %v6588_v61  ;;  %4311 = vmatprep.subr.bf16.mxu0 %v6593_v2 }
 0x25f   :  { %4352 = vmatprep.subr.bf16.mxu1 %v6596_v3  ;;  %v6687_v3 = vld [vmem:[#allocation6 + $0x170] ss:$8 sps:$4 sm:$0xff]  }
 0x261   :  { %4312 = vmatpush2.bf16.msra.mxu0 %v6591_v1  ;;  %v6689_v1 = vld [vmem:[#allocation6 + $0x174] ss:$8 sps:$4 sm:$0xff]  }
 0x262   :  { %4353 = vmatpush2.bf16.msra.mxu1 %v6594_v4  ;;  %4313 = vmatprep.subr.bf16.mxu0 %v6599_v35  ;;  %v6692_v4 = vld [vmem:[#allocation6 + $0x164] ss:$8 sps:$4 sm:$0xff]   ;;  %v6648_v35 = vld [vmem:[#allocation6 + $0x40] ss:$8 sps:$4 sm:$0xff]  }
 0x263   :  { %4354 = vmatprep.subr.bf16.mxu1 %v6602_v5  ;;  %v6690_v5 = vld [vmem:[#allocation6 + $0x160] ss:$8 sps:$4 sm:$0xff]  }
 0x265   :  { %4314 = vmatpush2.bf16.msra.mxu0 %v6597_v9  ;;  %v6653_v9 = vld [vmem:[#allocation6 + $0x34] ss:$8 sps:$4 sm:$0xff]  }
 0x266   :  { %4355 = vmatpush2.bf16.msra.mxu1 %v6600_v10  ;;  %4315 = vmatprep.subr.bf16.mxu0 %v6605_v11  ;;  %v6695_v10 = vld [vmem:[#allocation6 + $0x154] ss:$8 sps:$4 sm:$0xff]   ;;  %v6651_v11 = vld [vmem:[#allocation6 + $0x30] ss:$8 sps:$4 sm:$0xff]  }
 0x267   :  { %4356 = vmatprep.subr.bf16.mxu1 %v6608_v6  ;;  %v6693_v6 = vld [vmem:[#allocation6 + $0x150] ss:$8 sps:$4 sm:$0xff]  }
 0x269   :  { %4316 = vmatpush2.bf16.msra.mxu0 %v6603_v20  ;;  %v6656_v20 = vld [vmem:[#allocation6 + $0x24] ss:$8 sps:$4 sm:$0xff]  }
 0x26a   :  { %4357 = vmatpush2.bf16.msra.mxu1 %v6606_v14  ;;  %4317 = vmatprep.subr.bf16.mxu0 %v6611_v17  ;;  %v6698_v14 = vld [vmem:[#allocation6 + $0x144] ss:$8 sps:$4 sm:$0xff]   ;;  %v6654_v17 = vld [vmem:[#allocation6 + $0x20] ss:$8 sps:$4 sm:$0xff]  }
 0x26b   :  { %4358 = vmatprep.subr.bf16.mxu1 %v6614_v38  ;;  %v6696_v38 = vld [vmem:[#allocation6 + $0x140] ss:$8 sps:$4 sm:$0xff]  }
 0x26d   :  { %4318 = vmatpush2.bf16.msra.mxu0 %v6609_v15  ;;  %v6659_v15 = vld [vmem:[#allocation6 + $0x14] ss:$8 sps:$4 sm:$0xff]  }
 0x26e   :  { %4359 = vmatpush2.bf16.msra.mxu1 %v6612_v18  ;;  %4319 = vmatprep.subr.bf16.mxu0 %v6617_v28  ;;  %v6701_v18 = vld [vmem:[#allocation6 + $0x134] ss:$8 sps:$4 sm:$0xff]   ;;  %v6657_v28 = vld [vmem:[#allocation6 + $0x10] ss:$8 sps:$4 sm:$0xff]  }
 0x26f   :  { %4360 = vmatprep.subr.bf16.mxu1 %v6620_v19  ;;  %v6699_v19 = vld [vmem:[#allocation6 + $0x130] ss:$8 sps:$4 sm:$0xff]  }
 0x271   :  { %4320 = vmatpush2.bf16.msra.mxu0 %v6615_v51  ;;  %v6662_v51 = vld [vmem:[#allocation6 + $0x4] ss:$8 sps:$4 sm:$0xff]  }
 0x272   :  { %4361 = vmatpush2.bf16.msra.mxu1 %v6618_v36  ;;  %4321 = vmatprep.subr.bf16.mxu0 %v6623_v40  ;;  %v6704_v36 = vld [vmem:[#allocation6 + $0x124] ss:$8 sps:$4 sm:$0xff]   ;;  %v6660_v40 = vld [vmem:[#allocation6] ss:$8 sps:$4 sm:$0xff]  }
 0x273   :  { %4362 = vmatprep.subr.bf16.mxu1 %v6626_v25  ;;  %v6702_v25 = vld [vmem:[#allocation6 + $0x120] ss:$8 sps:$4 sm:$0xff]  }
 0x275   :  { %4322 = vmatpush2.bf16.msra.mxu0 %v6621_v22  ;;  %v6665_v22 = vld [vmem:[#allocation6 + $0xf4] ss:$8 sps:$4 sm:$0xff]  }
 0x276   :  { %4363 = vmatpush2.bf16.msra.mxu1 %v6624_v21  ;;  %4323 = vmatprep.subr.bf16.mxu0 %v6629_v29  ;;  %v6707_v21 = vld [vmem:[#allocation6 + $0x114] ss:$8 sps:$4 sm:$0xff]   ;;  %v6663_v29 = vld [vmem:[#allocation6 + $0xf0] ss:$8 sps:$4 sm:$0xff]  }
 0x277   :  { %4364 = vmatprep.subr.bf16.mxu1 %v6632_v30  ;;  %v6705_v30 = vld [vmem:[#allocation6 + $0x110] ss:$8 sps:$4 sm:$0xff]  }
 0x279   :  { %4324 = vmatpush2.bf16.msra.mxu0 %v6627_v33  ;;  %v6668_v33 = vld [vmem:[#allocation6 + $0xe4] ss:$8 sps:$4 sm:$0xff]  }
 0x27a   :  { %4365 = vmatpush2.bf16.msra.mxu1 %v6630_v34  ;;  %4325 = vmatprep.subr.bf16.mxu0 %v6635_v39  ;;  %v6710_v34 = vld [vmem:[#allocation6 + $0x104] ss:$8 sps:$4 sm:$0xff]   ;;  %v6666_v39 = vld [vmem:[#allocation6 + $0xe0] ss:$8 sps:$4 sm:$0xff]  }
 0x27b   :  { %4366 = vmatprep.subr.bf16.mxu1 %v6638_v63  ;;  %v6708_v63 = vld [vmem:[#allocation6 + $0x100] ss:$8 sps:$4 sm:$0xff]  }
 0x27d   :  { %4326 = vmatpush2.bf16.msra.mxu0 %v6633_v47  ;;  %v6711_v47 = vld [vmem:[#allocation6 + $0x1f0] ss:$8 sps:$4 sm:$0xff]  }
 0x27e   :  { %4367 = vmatpush2.bf16.msra.mxu1 %v6636_v43  ;;  %4781 = vmatprep.subr.bf16.mxu0 %v6641_v44  ;;  %v6674_v43 = vld [vmem:[#allocation6 + $0xc4] ss:$8 sps:$4 sm:$0xff]  }
 0x27f   :  { %4822 = vmatprep.subr.bf16.mxu1 %v6689_v1  ;;  %v6716_v44 = vld [vmem:[#allocation6 + $0x1e4] ss:$8 sps:$4 sm:$0xff]  }
 0x280   :  { %v4083_v52 = vpop.f32.mrf.mxu0  ;;  %4328 = vmatmul.mubr.bf16.vlgmr.msra.gmra.mxu0 %v7030_v0  ;;  %v6645_v0 = vld [vmem:[#allocation6 + $0x50] ss:$8 sps:$4 sm:$0xff]  }
 0x281   :  { %v4124_v7 = vpop.f32.mrf.mxu1  ;;  %4369 = vmatmul.mubr.bf16.vlgmr.msra.gmra.mxu1 %v7055_v55  ;;  %v4084_v54 = vadd.f32 %v4083_v52, %v4043_v48  ;;  %4782 = vmatpush1.bf16.msra.mxu0 %v6639_v49  ;;  %v6675_v49 = vld [vmem:[#allocation6 + $0xb0] ss:$8 sps:$4 sm:$0xff]   ;;  %v6680_v48 = vld [vmem:[#allocation6 + $0xa4] ss:$8 sps:$4 sm:$0xff]   ;;  %v6678_v52 = vld [vmem:[#allocation6 + $0xa0] ss:$8 sps:$4 sm:$0xff]  }
 0x282   :  { %4813 = vmatprep.mubr.bf16.mxu0 %v4382_v31  ;;  %v4085_v57 = vpop.f32.mrf.mxu0  ;;  %4783 = vmatprep.subr.bf16.mxu0 %v6644_v50  ;;  %v6717_v50 = vld [vmem:[#allocation6 + $0x1d0] ss:$8 sps:$4 sm:$0xff]   ;;  %v6722_v31 = vld [vmem:[#allocation6 + $0x1c4] ss:$8 sps:$4 sm:$0xff]  }
 0x283   :  { %v4126_v58 = vpop.f32.mrf.mxu1  ;;  %v7108_v60 = vadd.f32 %v4124_v7, %v4084_v54  ;;  %v4086_v26 = vadd.f32 %v4085_v57, %v4045_v16  ;;  %4823 = vmatpush1.bf16.msra.mxu1 %v6687_v3  ;;  %v6720_v7 = vld [vmem:[#allocation6 + $0x1c0] ss:$8 sps:$4 sm:$0xff]   ;;  %v6683_v16 = vld [vmem:[#allocation6 + $0x94] ss:$8 sps:$4 sm:$0xff]   ;;  %v6723_v57 = vld [vmem:[#allocation6 + $0x1b0] ss:$8 sps:$4 sm:$0xff]  }
 0x284   :  { %v4087_v37 = vpop.f32.mrf.mxu0  ;;  %4824 = vmatprep.subr.bf16.mxu1 %v6692_v4  ;;  %v6725_v54 = vld [vmem:[#allocation6 + $0x1b4] ss:$8 sps:$4 sm:$0xff]  }
 0x285   :  { %v4128_v24 = vpop.f32.mrf.mxu1  ;;  %v7110_v61 = vadd.f32 %v4126_v58, %v4086_v26  ;;  %4784 = vmatpush1.bf16.msra.mxu0 %v6642_v56  ;;  %v6681_v56 = vld [vmem:[#allocation6 + $0x90] ss:$8 sps:$4 sm:$0xff]   ;;  %v6686_v58 = vld [vmem:[#allocation6 + $0x84] ss:$8 sps:$4 sm:$0xff]   ;;  %v4377_v26 = vmax.f32 %v7092_v27, 0.0 }
 0x286   :  { %v4088_v55 = vpop.f32.mrf.mxu0  ;;  %4785 = vmatprep.subr.bf16.mxu0 %v6647_v12  ;;  %v6684_v12 = vld [vmem:[#allocation6 + $0x80] ss:$8 sps:$4 sm:$0xff]   ;;  %v6728_v24 = vld [vmem:[#allocation6 + $0x1a4] ss:$8 sps:$4 sm:$0xff]   ;;  %v6731_v4 = vld [vmem:[#allocation6 + $0x194] ss:$8 sps:$4 sm:$0xff]  }
 0x287   :  { %v4129_v2 = vpop.f32.mrf.mxu1  ;;  %4825 = vmatpush1.bf16.msra.mxu1 %v6690_v5  ;;  %v4381_v37 = vpack.c.bf16 %v4377_v26, %v4377_v26 }
 0x288   :  { %4826 = vmatprep.subr.bf16.mxu1 %v6695_v10 }
 0x289   :  { %4786 = vmatpush1.bf16.msra.mxu0 %v6645_v0  ;;  %v6726_v0 = vld [vmem:[#allocation6 + $0x1a0] ss:$8 sps:$4 sm:$0xff]  }
 0x28a   :  { %4787 = vmatprep.subr.bf16.mxu0 %v6650_v32 }
 0x28b   :  { %4827 = vmatpush1.bf16.msra.mxu1 %v6693_v6 }
 0x28c   :  { %4828 = vmatprep.subr.bf16.mxu1 %v6698_v14  ;;  %v6734_v14 = vld [vmem:[#allocation6 + $0x184] ss:$8 sps:$4 sm:$0xff]  }
 0x28d   :  { %4788 = vmatpush1.bf16.msra.mxu0 %v6648_v35 }
 0x28e   :  { %4789 = vmatprep.subr.bf16.mxu0 %v6653_v9  ;;  %v6729_v9 = vld [vmem:[#allocation6 + $0x190] ss:$8 sps:$4 sm:$0xff]  }
 0x28f   :  { %4829 = vmatpush1.bf16.msra.mxu1 %v6696_v38 }
 0x290   :  { %4830 = vmatprep.subr.bf16.mxu1 %v6701_v18 }
 0x291   :  { %4790 = vmatpush1.bf16.msra.mxu0 %v6651_v11 }
 0x292   :  { %4791 = vmatprep.subr.bf16.mxu0 %v6656_v20 }
 0x293   :  { %4831 = vmatpush1.bf16.msra.mxu1 %v6699_v19 }
 0x294   :  { %4832 = vmatprep.subr.bf16.mxu1 %v6704_v36 }
 0x295   :  { %4792 = vmatpush1.bf16.msra.mxu0 %v6654_v17  ;;  %v6732_v17 = vld [vmem:[#allocation6 + $0x180] ss:$8 sps:$4 sm:$0xff]  }
 0x296   :  { %4793 = vmatprep.subr.bf16.mxu0 %v6659_v15 }
 0x297   :  { %4833 = vmatpush1.bf16.msra.mxu1 %v6702_v25  ;;  %v6735_v25 = vld [vmem:[%s7175_s5 + $0x78] sm:$0xff]  }
 0x298   :  { %4834 = vmatprep.subr.bf16.mxu1 %v6707_v21  ;;  %v6737_v21 = vld [vmem:[%s7175_s5 + $0x70] sm:$0xff]  }
 0x299   :  { %4794 = vmatpush1.bf16.msra.mxu0 %v6657_v28 }
 0x29a   :  { %4795 = vmatprep.subr.bf16.mxu0 %v6662_v51 }
 0x29b   :  { %4835 = vmatpush1.bf16.msra.mxu1 %v6705_v30  ;;  %v6739_v30 = vld [vmem:[%s7175_s5 + $0x68] sm:$0xff]  }
 0x29c   :  { %4836 = vmatprep.subr.bf16.mxu1 %v6710_v34  ;;  %v6741_v34 = vld [vmem:[%s7175_s5 + $0x60] sm:$0xff]  }
 0x29d   :  { %4796 = vmatpush1.bf16.msra.mxu0 %v6660_v40 }
 0x29e   :  { %4797 = vmatprep.subr.bf16.mxu0 %v6665_v22  ;;  %v6736_v22 = vld [vmem:[%s7175_s5 + $0x38] sm:$0xff]  }
 0x29f   :  { %4837 = vmatpush1.bf16.msra.mxu1 %v6708_v63  ;;  %v6743_v63 = vld [vmem:[%s7175_s5 + $0x58] sm:$0xff]  }
 0x2a0   :  { %4838 = vmatprep.subr.bf16.mxu1 %v6713_v41  ;;  %v6745_v41 = vld [vmem:[%s7175_s5 + $0x50] sm:$0xff]  }
 0x2a1   :  { %4798 = vmatpush2.bf16.msra.mxu0 %v6663_v29  ;;  %v6738_v29 = vld [vmem:[%s7175_s5 + $0x30] sm:$0xff]  }
 0x2a2   :  { %4799 = vmatprep.subr.bf16.mxu0 %v6668_v33  ;;  %v6740_v33 = vld [vmem:[%s7175_s5 + $0x28] sm:$0xff]  }
 0x2a3   :  { %4839 = vmatpush2.bf16.msra.mxu1 %v6711_v47 }
 0x2a4   :  { %4840 = vmatprep.subr.bf16.mxu1 %v6716_v44 }
 0x2a5   :  { %4800 = vmatpush2.bf16.msra.mxu0 %v6666_v39  ;;  %v6742_v39 = vld [vmem:[%s7175_s5 + $0x20] sm:$0xff]  }
 0x2a6   :  { %4801 = vmatprep.subr.bf16.mxu0 %v6671_v13  ;;  %v6744_v13 = vld [vmem:[%s7175_s5 + $0x18] sm:$0xff]  }
 0x2a7   :  { %4841 = vmatpush2.bf16.msra.mxu1 %v6714_v46 }
 0x2a8   :  { %4842 = vmatprep.subr.bf16.mxu1 %v6719_v8 }
 0x2a9   :  { %4802 = vmatpush2.bf16.msra.mxu0 %v6669_v42  ;;  %v6746_v42 = vld [vmem:[%s7175_s5 + $0x10] sm:$0xff]  }
 0x2aa   :  { %4803 = vmatprep.subr.bf16.mxu0 %v6674_v43 }
 0x2ab   :  { %4843 = vmatpush2.bf16.msra.mxu1 %v6717_v50 }
 0x2ac   :  { %4844 = vmatprep.subr.bf16.mxu1 %v6722_v31 }
 0x2ad   :  { %4804 = vmatpush2.bf16.msra.mxu0 %v6672_v45 }
 0x2ae   :  { %4805 = vmatprep.subr.bf16.mxu0 %v6677_v23 }
 0x2af   :  { %4845 = vmatpush2.bf16.msra.mxu1 %v6720_v7 }
 0x2b0   :  { %4846 = vmatprep.subr.bf16.mxu1 %v6725_v54 }
 0x2b1   :  { %4806 = vmatpush2.bf16.msra.mxu0 %v6675_v49 }
 0x2b2   :  { %4807 = vmatprep.subr.bf16.mxu0 %v6680_v48 }
 0x2b3   :  { %4847 = vmatpush2.bf16.msra.mxu1 %v6723_v57 }
 0x2b4   :  { %4848 = vmatprep.subr.bf16.mxu1 %v6728_v24 }
 0x2b5   :  { %4808 = vmatpush2.bf16.msra.mxu0 %v6678_v52 }
 0x2b6   :  { %4809 = vmatprep.subr.bf16.mxu0 %v6683_v16 }
 0x2b7   :  { %4849 = vmatpush2.bf16.msra.mxu1 %v6726_v0  ;;  %v6747_v0 = vld [vmem:[%s7175_s5 + $0x48] sm:$0xff]  }
 0x2b8   :  { %4850 = vmatprep.subr.bf16.mxu1 %v6731_v4 }
 0x2b9   :  { %4810 = vmatpush2.bf16.msra.mxu0 %v6681_v56 }
 0x2ba   :  { %4811 = vmatprep.subr.bf16.mxu0 %v6686_v58 }
 0x2bb   :  { %4851 = vmatpush2.bf16.msra.mxu1 %v6729_v9 }
 0x2bc   :  { %4852 = vmatprep.subr.bf16.mxu1 %v6734_v14 }
 0x2bd   :  { %4812 = vmatpush2.bf16.msra.mxu0 %v6684_v12 }
 0x2be   :  { %5726 = vmatprep.subr.bf16.mxu0 %v6735_v25 }
 0x2bf   :  { %4853 = vmatpush2.bf16.msra.mxu1 %v6732_v17 }
 0x2c0   :  { %v4165_v55 = vpop.f32.mrf.mxu0  ;;  %4814 = vmatmul.mubr.bf16.vlgmr.msra.gmra.mxu0 %v4381_v37 }
 0x2c1   :  { %v4206_v2 = vpop.f32.mrf.mxu1  ;;  %v4166_v32 = vadd.f32 %v4165_v55, %v7108_v60  ;;  %5727 = vmatpush3.bf16.msra.mxu0 %v6736_v22  ;;  %v6748_v55 = vld [vmem:[%s7175_s5 + $0x8] sm:$0xff]  }
 0x2c2   :  { %v4167_v3 = vpop.f32.mrf.mxu0  ;;  %5728 = vmatprep.subr.bf16.mxu0 %v6737_v21 }
 0x2c3   :  { %v4208_v1 = vpop.f32.mrf.mxu1  ;;  %v4207_v35 = vadd.f32 %v4206_v2, %v4166_v32  ;;  %v4168_v5 = vadd.f32 %v4167_v3, %v7110_v61  ;;  %v6749_v2 = vld [vmem:[%s7175_s5 + $0x40] sm:$0xff]  }
 0x2c4   :  { %v4169_v27 = vpop.f32.mrf.mxu0  ;;  %v6750_v32 = vld [vmem:[%s7175_s5] sm:$0xff]  }
 0x2c5   :  { %v4210_v10 = vpop.f32.mrf.mxu1  ;;  %v4209_v11 = vadd.f32 %v4208_v1, %v4168_v5  ;;  %5729 = vmatpush3.bf16.msra.mxu0 %v6738_v29  ;;  %v4449_v3 = vld [vmem:[#allocation7] sm:$0x3] }
 0x2c6   :  { %v4170_v6 = vpop.f32.mrf.mxu0  ;;  %5730 = vmatprep.subr.bf16.mxu0 %v6739_v30  ;;  %v4454_v1 = vrot.slane %v4449_v3, %v678_v59  ;;  %v4458_v4 = vrot.slane %v4449_v3, %v682_v62 }
 0x2c7   :  { %v4211_v20 = vpop.f32.mrf.mxu1 }
 0x2c9   :  { %5731 = vmatpush3.bf16.msra.mxu0 %v6740_v33 }
 0x2ca   :  { %5732 = vmatprep.subr.bf16.mxu0 %v6741_v34 }
 0x2cd   :  { %5733 = vmatpush3.bf16.msra.mxu0 %v6742_v39 }
 0x2ce   :  { %5734 = vmatprep.subr.bf16.mxu0 %v6743_v63 }
 0x2d1   :  { %5735 = vmatpush3.bf16.msra.mxu0 %v6744_v13 }
 0x2d2   :  { %5736 = vmatprep.subr.bf16.mxu0 %v6745_v41 }
 0x2d5   :  { %5737 = vmatpush3.bf16.msra.mxu0 %v6746_v42 }
 0x2d6   :  { %5738 = vmatprep.subr.bf16.mxu0 %v6747_v0 }
 0x2d9   :  { %5739 = vmatpush3.bf16.msra.mxu0 %v6748_v55 }
 0x2da   :  { %5740 = vmatprep.subr.bf16.mxu0 %v6749_v2 }
 0x2dd   :  { %5741 = vmatpush3.bf16.msra.mxu0 %v6750_v32 }
 0x300   :  { %v4247_v60 = vpop.f32.mrf.mxu0 }
 0x301   :  { %v4288_v38 = vpop.f32.mrf.mxu1  ;;  %v4248_v15 = vadd.f32 %v4247_v60, %v4207_v35 }
 0x302   :  { %v4249_v18 = vpop.f32.mrf.mxu0 }
 0x303   :  { %v4290_v28 = vpop.f32.mrf.mxu1  ;;  %v4289_v19 = vadd.f32 %v4288_v38, %v4248_v15  ;;  %v4250_v47 = vadd.f32 %v4249_v18, %v4209_v11  ;;  %v5709_v18 = vld [vmem:[#allocation9] ss:$0 sm:$0xff] }
 0x304   :  { %v4251_v51 = vpop.f32.mrf.mxu0 }
 0x305   :  { %v4292_v61 = vpop.f32.mrf.mxu1  ;;  %v4291_v45 = vadd.f32 %v4290_v28, %v4250_v47 }
 0x306   :  { %v4252_v36 = vpop.f32.mrf.mxu0 }
 0x307   :  { %v4293_v40 = vpop.f32.mrf.mxu1 }
 0x340   :  { %v4329_v43 = vpop.f32.mrf.mxu0 }
 0x341   :  { %v4370_v44 = vpop.f32.mrf.mxu1  ;;  %v4330_v46 = vadd.f32 %v4329_v43, %v4289_v19 }
 0x342   :  { %v4331_v23 = vpop.f32.mrf.mxu0 }
 0x343   :  { %v4372_v8 = vpop.f32.mrf.mxu1  ;;  %v4371_v49 = vadd.f32 %v4370_v44, %v4330_v46  ;;  %v4332_v50 = vadd.f32 %v4331_v23, %v4291_v45 }
 0x344   :  { %v4333_v48 = vpop.f32.mrf.mxu0 }
 0x345   :  { %v4374_v31 = vpop.f32.mrf.mxu1  ;;  %v4373_v52 = vadd.f32 %v4372_v8, %v4332_v50  ;;  %v4379_v7 = vmax.f32 %v4371_v49, 0.0 }
 0x346   :  { %v4334_v16 = vpop.f32.mrf.mxu0 }
 0x347   :  { %v4375_v54 = vpop.f32.mrf.mxu1  ;;  %v4380_v56 = vmax.f32 %v4373_v52, 0.0  ;;  %v4383_v58 = vpack.c.bf16 %v4379_v7, %v4379_v7 }
 0x349   :  { %v4384_v57 = vpack.c.bf16 %v4380_v56, %v4380_v56 }
 0x34b   :  { %4854 = vmatprep.mubr.bf16.mxu1 %v4384_v57 }
 0x34c   :  { %4855 = vmatmul.mubr.bf16.vlgmr.msra.gmra.mxu1 %v4383_v58 }
 0x380   :  { %v4815_v12 = vpop.f32.mrf.mxu0 }
 0x381   :  { %v4816_v35 = vadd.f32 %v4815_v12, %v4454_v1 }
 0x382   :  { %v4817_v26 = vpop.f32.mrf.mxu0 }
 0x383   :  { %v4818_v9 = vadd.f32 %v4817_v26, %v4458_v4 }
 0x384   :  { %v4819_v37 = vpop.f32.mrf.mxu0 }
 0x386   :  { %v4820_v24 = vpop.f32.mrf.mxu0 }
 0x40c   :  { %v4856_v5 = vpop.f32.mrf.mxu1 }
 0x40d   :  { %v4857_v27 = vadd.f32 %v4856_v5, %v4816_v35 }
 0x40e   :  { %v4858_v10 = vpop.f32.mrf.mxu1 }
 0x40f   :  { %v4859_v11 = vadd.f32 %v4858_v10, %v4818_v9  ;;  %v4863_v6 = vmax.f32 %v4857_v27, 0.0 }
 0x410   :  { %v4860_v20 = vpop.f32.mrf.mxu1 }
 0x411   :  { %v4864_v14 = vmax.f32 %v4859_v11, 0.0  ;;  %v4865_v38 = vpack.c.bf16 %v4863_v6, %v4863_v6 }
 0x412   :  { %v4861_v17 = vpop.f32.mrf.mxu1 }
 0x413   :  { %v4866_v60 = vpack.c.bf16 %v4864_v14, %v4864_v14 }
 0x415   :  { %5034 = vmatprep.mubr.bf16.mxu0 %v4866_v60 }
 0x416   :  { %5035 = vmatmul.mubr.bf16.vlgmr.msra.gmra.mxu0 %v4865_v38 }
 0x4d6   :  { %v5742_v15 = vpop.f32.mrf.mxu0 }
 0x4d8   :  { %v5743_v59 = vpop.f32.mrf.mxu0 }
 0x4d9   :  { %v5744_v28 = vadd.f32 %v5743_v59, %v5742_v15 }
 0x4da   :  { %v5745_v53 = vpop.f32.mrf.mxu0 }
 0x4db   :  { %v5037_v62 = vadd.f32 %v5744_v28, %v5709_v18 }
 0x4dc   :  { %v5746_v19 = vpop.f32.mrf.mxu0 }
 0x4dd   :  { %5043 = vst.msk [vmem:[%s7177_s7] sm:$0xff] %vm5042_vm0, %v5037_v62 }
 0x4de   :  { %5048 = vsyncpa [#allocation3], 1 }
 0x4df   :  { %5049 = vsyncpa [#allocation5], 1 }
 0x4e0   :  { %5050 = vsyncpa [#allocation8], 1 }

</bundles_post_ra>
